<compile_context>
chip_gen: v5e
topology: v5e:2x2
jax: 0.10.0
libtpu: 0.0.40
codegen_flags: <defaults>
</compile_context>

<pallas_src>
import jax
import jax.numpy as jnp
from jax.experimental import pallas as pl
from jax.experimental.pallas import tpu as pltpu


# --------------------------------------------------------------------------------------
# Kernel
# --------------------------------------------------------------------------------------
def _dcmlp_kernel(
    x_ref,
    w12_ref, b12_ref,      # (in_dim, H0p), (1, H0p)
    w2a_ref, b2a_ref,      # [w23|w24|w25] -> (H0p, H1p+H2p+H3p), (1, H1p+H2p+H3p)
    w3a_ref, b3a_ref,      # [w34|w35]     -> (H1p, H2p+H3p),      (1, H2p+H3p)
    w45_ref, b45_ref,      # (H2p, H3p), (1, H3p)
    w56_ref, b56_ref,      # (H3p, out_dim), (1, out_dim)   -- classifier kept unpadded in N
    out_ref,               # (bt, out_dim)
):
    # Static split points, recovered from the (static) ref shapes.
    h1p = w3a_ref.shape[0]
    h2p, h3p = w45_ref.shape

    def lin(h, w_ref, b_ref):
        w = w_ref[...]
        # MXU matmul in the weight dtype (bf16 or f32); accumulation always f32.
        return jnp.dot(h.astype(w.dtype), w,
                       preferred_element_type=jnp.float32) + b_ref[...]

    x = x_ref[...]

    # h2 = relu(fc1_2(x))                                       (bt, H0p)
    h2 = jnp.maximum(lin(x, w12_ref, b12_ref), 0.0)

    # One wide matmul from h2: [fc2_3 | fc2_4 | fc2_5]          (bt, H1p+H2p+H3p)
    y2 = lin(h2, w2a_ref, b2a_ref)
    h3 = jnp.maximum(y2[:, :h1p], 0.0)          # relu(fc2_3(h2))
    y24 = y2[:, h1p:h1p + h2p]                  # fc2_4(h2)
    y25 = y2[:, h1p + h2p:]                     # fc2_5(h2)

    # One wide matmul from h3: [fc3_4 | fc3_5]                  (bt, H2p+H3p)
    y3 = lin(h3, w3a_ref, b3a_ref)
    h4 = jnp.maximum(y3[:, :h2p] + y24, 0.0)    # relu(fc3_4(h3) + fc2_4(h2))

    # h5 = relu(fc4_5(h4) + fc2_5(h2) + fc3_5(h3))              (bt, H3p)
    h5 = jnp.maximum(lin(h4, w45_ref, b45_ref) + y25 + y3[:, h2p:], 0.0)

    # logits = fc5_6(h5)                                        (bt, out_dim)
    logits = lin(h5, w56_ref, b56_ref)

    # log_softmax over the true class dim.
    m = jnp.max(logits, axis=-1, keepdims=True)
    shifted = logits - m
    lse = jnp.log(jnp.sum(jnp.exp(shifted), axis=-1, keepdims=True))
    out_ref[...] = (shifted - lse).astype(out_ref.dtype)


# --------------------------------------------------------------------------------------
# One-time parameter preparation (fusion + lane padding + dtype cast)
# --------------------------------------------------------------------------------------
def _round_up(n, m=128):
    return ((n + m - 1) // m) * m


def _pad2d(a, rows, cols):
    r, c = a.shape
    return jnp.pad(a, ((0, rows - r), (0, cols - c)))


def prepare_params(params, *, weight_dtype=jnp.bfloat16):
    """Fuse skip-connection weights along out-features, zero-pad hidden dims to 128 lanes,
    and cast weights to `weight_dtype` (biases stay f32). Call ONCE, reuse every forward."""
    w12, b12 = params["fc1_2"]
    w23, b23 = params["fc2_3"]
    w24, b24 = params["fc2_4"]
    w25, b25 = params["fc2_5"]
    w34, b34 = params["fc3_4"]
    w35, b35 = params["fc3_5"]
    w45, b45 = params["fc4_5"]
    w56, b56 = params["fc5_6"]

    in_dim = w12.shape[0]
    h0, h1, h2, h3 = w12.shape[1], w23.shape[1], w24.shape[1], w25.shape[1]
    out_dim = w56.shape[1]
    h0p, h1p, h2p, h3p = (_round_up(h) for h in (h0, h1, h2, h3))

    w12p, b12p = _pad2d(w12, in_dim, h0p), _pad2d(b12, 1, h0p)

    # From h2: [fc2_3 | fc2_4 | fc2_5]  (N-fusion: concat along out-features)
    w2a = jnp.concatenate(
        [_pad2d(w23, h0p, h1p), _pad2d(w24, h0p, h2p), _pad2d(w25, h0p, h3p)], axis=1)
    b2a = jnp.concatenate(
        [_pad2d(b23, 1, h1p), _pad2d(b24, 1, h2p), _pad2d(b25, 1, h3p)], axis=1)

    # From h3: [fc3_4 | fc3_5]
    w3a = jnp.concatenate([_pad2d(w34, h1p, h2p), _pad2d(w35, h1p, h3p)], axis=1)
    b3a = jnp.concatenate([_pad2d(b34, 1, h2p), _pad2d(b35, 1, h3p)], axis=1)

    w45p, b45p = _pad2d(w45, h2p, h3p), _pad2d(b45, 1, h3p)
    w56p, b56p = _pad2d(w56, h3p, out_dim), b56        # classifier columns left unpadded

    wd = jnp.dtype(weight_dtype)
    ws = [w.astype(wd) for w in (w12p, w2a, w3a, w45p, w56p)]
    bs = [b.astype(jnp.float32) for b in (b12p, b2a, b3a, b45p, b56p)]
    return (ws[0], bs[0], ws[1], bs[1], ws[2], bs[2], ws[3], bs[3], ws[4], bs[4])


# --------------------------------------------------------------------------------------
# Forward wrapper
# --------------------------------------------------------------------------------------
def _pick_batch_tile(B, weight_dtype, target=512):
    """Largest divisor of B that is <= min(target, B//2) and a multiple of the row alignment
    (16 for bf16 sublane packing, 8 for f32). Capping at B//2 guarantees >=2 grid steps so
    v7x can shard batch tiles across its two TensorCores. Falls back to B (grid=1)."""
    align = 16 if jnp.dtype(weight_dtype) == jnp.bfloat16 else 8
    if B < 2 * align:
        return B
    cap = min(target, B // 2)
    cap -= cap % align
    t = cap
    while t >= align:
        if B % t == 0:
            return t
        t -= align
    return B


def dcmlp_r3_forward(x, prepared, *, batch_tile=None):
    """x: (B, input_size) f32. prepared: output of prepare_params()."""
    (w12, b12, w2a, b2a, w3a, b3a, w45, b45, w56, b56) = prepared
    B, in_dim = x.shape
    wd = w12.dtype
    if batch_tile is None:
        batch_tile = _pick_batch_tile(B, wd)
    assert B % batch_tile == 0, "B must be divisible by batch_tile"
    out_dim = w56.shape[1]

    # Cast the input to the weight dtype wrapper-side (halves x DMA bytes on the bf16 path);
    # all intermediate activations stay f32 inside the kernel and are cast right before each dot.
    x_in = x if x.dtype == wd else x.astype(wd)

    flat_args = [x_in]
    in_specs = [pl.BlockSpec((batch_tile, in_dim), lambda i: (i, 0))]
    for arr in (w12, b12, w2a, b2a, w3a, b3a, w45, b45, w56, b56):
        flat_args.append(arr)
        in_specs.append(pl.BlockSpec(arr.shape, lambda i: (0, 0)))  # grid-invariant

    return pl.pallas_call(
        _dcmlp_kernel,
        out_shape=jax.ShapeDtypeStruct((B, out_dim), jnp.float32),
        grid_spec=pltpu.PrefetchScalarGridSpec(
            num_scalar_prefetch=0,
            grid=(B // batch_tile,),
            in_specs=in_specs,
            out_specs=pl.BlockSpec((batch_tile, out_dim), lambda i: (i, 0)),
        ),
        compiler_params=pltpu.CompilerParams(
            # Batch tiles are independent -> shard across v7x's two TensorCores.
            dimension_semantics=("parallel",),
        ),
    )(*flat_args)


# --------------------------------------------------------------------------------------
# Reference + init (pure JAX)
# --------------------------------------------------------------------------------------
def init_params(key, input_size, output_size, hidden_sizes):
    """nn.Linear-style init. Weights stored (in_features, out_features); biases (1, out_features)."""
    shapes = {
        "fc1_2": (input_size, hidden_sizes[0]),
        "fc2_3": (hidden_sizes[0], hidden_sizes[1]),
        "fc2_4": (hidden_sizes[0], hidden_sizes[2]),
        "fc2_5": (hidden_sizes[0], hidden_sizes[3]),
        "fc3_4": (hidden_sizes[1], hidden_sizes[2]),
        "fc3_5": (hidden_sizes[1], hidden_sizes[3]),
        "fc4_5": (hidden_sizes[2], hidden_sizes[3]),
        "fc5_6": (hidden_sizes[3], output_size),
    }
    params = {}
    for name, (fan_in, fan_out) in shapes.items():
        key, kw, kb = jax.random.split(key, 3)
        bound = 1.0 / jnp.sqrt(fan_in)
        w = jax.random.uniform(kw, (fan_in, fan_out), jnp.float32, -bound, bound)
        b = jax.random.uniform(kb, (1, fan_out), jnp.float32, -bound, bound)
        params[name] = (w, b)
    return params


def reference_forward(x, params):
    def lin(h, name):
        w, b = params[name]
        return h @ w + b

    h2 = jax.nn.relu(lin(x, "fc1_2"))
    x2_4 = lin(h2, "fc2_4")
    x2_5 = lin(h2, "fc2_5")
    h3 = jax.nn.relu(lin(h2, "fc2_3"))
    x3_5 = lin(h3, "fc3_5")
    h4 = jax.nn.relu(lin(h3, "fc3_4") + x2_4)
    h5 = jax.nn.relu(lin(h4, "fc4_5") + x2_5 + x3_5)
    logits = lin(h5, "fc5_6")
    return jax.nn.log_softmax(logits, axis=1)


# --------------------------------------------------------------------------------------
# Test
# --------------------------------------------------------------------------------------
if __name__ == "__main__":
    # Shapes consistent with the module; batch chosen so the auto-picked tile gives a >=2-step
    # grid (exercises the BlockSpec pipeline and v7x two-core sharding).
    batch = 256
    input_size = 32
    hidden_sizes = (64, 64, 64, 64)
    output_size = 16

    key = jax.random.PRNGKey(0)
    key, kx = jax.random.split(key)
    x = jax.random.normal(kx, (batch, input_size), jnp.float32)
    params = init_params(key, input_size, output_size, hidden_sizes)

    ref = reference_forward(x, params)

    # Default path: bf16 operands / f32 accumulation (native MXU throughput on v5e/v6e/v7x).
    prep_bf16 = prepare_params(params, weight_dtype=jnp.bfloat16)
    fwd_bf16 = jax.jit(lambda xx: dcmlp_r3_forward(xx, prep_bf16))
    out_bf16 = jax.block_until_ready(fwd_bf16(x))
    assert out_bf16.shape == (batch, output_size)
    assert bool(jnp.all(jnp.isfinite(out_bf16)))
    assert float(jnp.max(jnp.abs(out_bf16 - ref))) < 0.15, "bf16 path drifted too far from reference"

    # f32 path: must match the JAX reference tightly.
    prep_f32 = prepare_params(params, weight_dtype=jnp.float32)
    fwd_f32 = jax.jit(lambda xx: dcmlp_r3_forward(xx, prep_f32))
    out_f32 = jax.block_until_ready(fwd_f32(x))
    assert out_f32.shape == (batch, output_size)
    assert jnp.allclose(out_f32, ref, atol=1e-4, rtol=1e-4), "f32 path mismatch vs JAX reference"

    print("KERNEL_OK")
</pallas_src>

<mosaic_0001>
module attributes {stable_mosaic.version = 11 : i64} {
  func.func @_dcmlp_kernel(%arg0: i32, %arg1: memref<128x32xbf16, #tpu.memory_space<vmem>>, %arg2: memref<32x128xbf16, #tpu.memory_space<vmem>>, %arg3: memref<1x128xf32, #tpu.memory_space<vmem>>, %arg4: memref<128x384xbf16, #tpu.memory_space<vmem>>, %arg5: memref<1x384xf32, #tpu.memory_space<vmem>>, %arg6: memref<128x256xbf16, #tpu.memory_space<vmem>>, %arg7: memref<1x256xf32, #tpu.memory_space<vmem>>, %arg8: memref<128x128xbf16, #tpu.memory_space<vmem>>, %arg9: memref<1x128xf32, #tpu.memory_space<vmem>>, %arg10: memref<128x16xbf16, #tpu.memory_space<vmem>>, %arg11: memref<1x16xf32, #tpu.memory_space<vmem>>, %arg12: memref<128x16xf32, #tpu.memory_space<vmem>>) attributes {dimension_semantics = [#tpu.dimension_semantics<parallel>], iteration_bounds = array<i64: 2>, scalar_prefetch = 0 : i64, scratch_operands = 0 : i64, tpu.core_type = #tpu.core_type<tc>, window_params = [{transform_indices = @transform_0, window_bounds = array<i64: 128, 32>}, {pipeline_mode = #tpu.pipeline_mode<synchronous>, transform_indices = @transform_1, window_bounds = array<i64: 32, 128>}, {pipeline_mode = #tpu.pipeline_mode<synchronous>, transform_indices = @transform_2, window_bounds = array<i64: 1, 128>}, {pipeline_mode = #tpu.pipeline_mode<synchronous>, transform_indices = @transform_3, window_bounds = array<i64: 128, 384>}, {pipeline_mode = #tpu.pipeline_mode<synchronous>, transform_indices = @transform_4, window_bounds = array<i64: 1, 384>}, {pipeline_mode = #tpu.pipeline_mode<synchronous>, transform_indices = @transform_5, window_bounds = array<i64: 128, 256>}, {pipeline_mode = #tpu.pipeline_mode<synchronous>, transform_indices = @transform_6, window_bounds = array<i64: 1, 256>}, {pipeline_mode = #tpu.pipeline_mode<synchronous>, transform_indices = @transform_7, window_bounds = array<i64: 128, 128>}, {pipeline_mode = #tpu.pipeline_mode<synchronous>, transform_indices = @transform_8, window_bounds = array<i64: 1, 128>}, {pipeline_mode = #tpu.pipeline_mode<synchronous>, transform_indices = @transform_9, window_bounds = array<i64: 128, 16>}, {pipeline_mode = #tpu.pipeline_mode<synchronous>, transform_indices = @transform_10, window_bounds = array<i64: 1, 16>}, {transform_indices = @transform_11, window_bounds = array<i64: 128, 16>}]} {
    %c0 = arith.constant 0 : index
    %c0_0 = arith.constant 0 : index
    %0 = vector.load %arg1[%c0, %c0_0] : memref<128x32xbf16, #tpu.memory_space<vmem>>, vector<128x32xbf16>
    %c0_1 = arith.constant 0 : index
    %c0_2 = arith.constant 0 : index
    %1 = vector.load %arg2[%c0_1, %c0_2] : memref<32x128xbf16, #tpu.memory_space<vmem>>, vector<32x128xbf16>
    %cst = arith.constant dense<0.000000e+00> : vector<128x128xf32>
    %2 = tpu.matmul %0, %1, %cst {dimension_numbers = #tpu.dot_dimension_numbers<[1], [0], [0], [1], [0, 0, 1, 1], [], []>} : vector<128x32xbf16>, vector<32x128xbf16>, vector<128x128xf32> -> vector<128x128xf32>
    %c0_3 = arith.constant 0 : index
    %c0_4 = arith.constant 0 : index
    %3 = vector.load %arg3[%c0_3, %c0_4] : memref<1x128xf32, #tpu.memory_space<vmem>>, vector<1x128xf32>
    %4 = vector.broadcast %3 : vector<1x128xf32> to vector<128x128xf32>
    %5 = arith.addf %2, %4 : vector<128x128xf32>
    %cst_5 = arith.constant 0.000000e+00 : f32
    %6 = vector.broadcast %cst_5 : f32 to vector<128x128xf32>
    %7 = arith.maximumf %5, %6 : vector<128x128xf32>
    %c0_6 = arith.constant 0 : index
    %c0_7 = arith.constant 0 : index
    %8 = vector.load %arg4[%c0_6, %c0_7] : memref<128x384xbf16, #tpu.memory_space<vmem>>, vector<128x384xbf16>
    %9 = arith.truncf %7 : vector<128x128xf32> to vector<128x128xbf16>
    %cst_8 = arith.constant dense<0.000000e+00> : vector<128x384xf32>
    %10 = tpu.matmul %9, %8, %cst_8 {dimension_numbers = #tpu.dot_dimension_numbers<[1], [0], [0], [1], [0, 0, 1, 1], [], []>} : vector<128x128xbf16>, vector<128x384xbf16>, vector<128x384xf32> -> vector<128x384xf32>
    %c0_9 = arith.constant 0 : index
    %c0_10 = arith.constant 0 : index
    %11 = vector.load %arg5[%c0_9, %c0_10] : memref<1x384xf32, #tpu.memory_space<vmem>>, vector<1x384xf32>
    %12 = vector.broadcast %11 : vector<1x384xf32> to vector<128x384xf32>
    %13 = arith.addf %10, %12 : vector<128x384xf32>
    %14 = vector.extract_strided_slice %13 {offsets = [0, 0], sizes = [128, 128], strides = [1, 1]} : vector<128x384xf32> to vector<128x128xf32>
    %cst_11 = arith.constant 0.000000e+00 : f32
    %15 = vector.broadcast %cst_11 : f32 to vector<128x128xf32>
    %16 = arith.maximumf %14, %15 : vector<128x128xf32>
    %17 = vector.extract_strided_slice %13 {offsets = [0, 128], sizes = [128, 128], strides = [1, 1]} : vector<128x384xf32> to vector<128x128xf32>
    %18 = vector.extract_strided_slice %13 {offsets = [0, 256], sizes = [128, 128], strides = [1, 1]} : vector<128x384xf32> to vector<128x128xf32>
    %c0_12 = arith.constant 0 : index
    %c0_13 = arith.constant 0 : index
    %19 = vector.load %arg6[%c0_12, %c0_13] : memref<128x256xbf16, #tpu.memory_space<vmem>>, vector<128x256xbf16>
    %20 = arith.truncf %16 : vector<128x128xf32> to vector<128x128xbf16>
    %cst_14 = arith.constant dense<0.000000e+00> : vector<128x256xf32>
    %21 = tpu.matmul %20, %19, %cst_14 {dimension_numbers = #tpu.dot_dimension_numbers<[1], [0], [0], [1], [0, 0, 1, 1], [], []>} : vector<128x128xbf16>, vector<128x256xbf16>, vector<128x256xf32> -> vector<128x256xf32>
    %c0_15 = arith.constant 0 : index
    %c0_16 = arith.constant 0 : index
    %22 = vector.load %arg7[%c0_15, %c0_16] : memref<1x256xf32, #tpu.memory_space<vmem>>, vector<1x256xf32>
    %23 = vector.broadcast %22 : vector<1x256xf32> to vector<128x256xf32>
    %24 = arith.addf %21, %23 : vector<128x256xf32>
    %25 = vector.extract_strided_slice %24 {offsets = [0, 0], sizes = [128, 128], strides = [1, 1]} : vector<128x256xf32> to vector<128x128xf32>
    %26 = arith.addf %25, %17 : vector<128x128xf32>
    %cst_17 = arith.constant 0.000000e+00 : f32
    %27 = vector.broadcast %cst_17 : f32 to vector<128x128xf32>
    %28 = arith.maximumf %26, %27 : vector<128x128xf32>
    %c0_18 = arith.constant 0 : index
    %c0_19 = arith.constant 0 : index
    %29 = vector.load %arg8[%c0_18, %c0_19] : memref<128x128xbf16, #tpu.memory_space<vmem>>, vector<128x128xbf16>
    %30 = arith.truncf %28 : vector<128x128xf32> to vector<128x128xbf16>
    %cst_20 = arith.constant dense<0.000000e+00> : vector<128x128xf32>
    %31 = tpu.matmul %30, %29, %cst_20 {dimension_numbers = #tpu.dot_dimension_numbers<[1], [0], [0], [1], [0, 0, 1, 1], [], []>} : vector<128x128xbf16>, vector<128x128xbf16>, vector<128x128xf32> -> vector<128x128xf32>
    %c0_21 = arith.constant 0 : index
    %c0_22 = arith.constant 0 : index
    %32 = vector.load %arg9[%c0_21, %c0_22] : memref<1x128xf32, #tpu.memory_space<vmem>>, vector<1x128xf32>
    %33 = vector.broadcast %32 : vector<1x128xf32> to vector<128x128xf32>
    %34 = arith.addf %31, %33 : vector<128x128xf32>
    %35 = arith.addf %34, %18 : vector<128x128xf32>
    %36 = vector.extract_strided_slice %24 {offsets = [0, 128], sizes = [128, 128], strides = [1, 1]} : vector<128x256xf32> to vector<128x128xf32>
    %37 = arith.addf %35, %36 : vector<128x128xf32>
    %cst_23 = arith.constant 0.000000e+00 : f32
    %38 = vector.broadcast %cst_23 : f32 to vector<128x128xf32>
    %39 = arith.maximumf %37, %38 : vector<128x128xf32>
    %c0_24 = arith.constant 0 : index
    %c0_25 = arith.constant 0 : index
    %40 = vector.load %arg10[%c0_24, %c0_25] : memref<128x16xbf16, #tpu.memory_space<vmem>>, vector<128x16xbf16>
    %41 = arith.truncf %39 : vector<128x128xf32> to vector<128x128xbf16>
    %cst_26 = arith.constant dense<0.000000e+00> : vector<128x16xf32>
    %42 = tpu.matmul %41, %40, %cst_26 {dimension_numbers = #tpu.dot_dimension_numbers<[1], [0], [0], [1], [0, 0, 1, 1], [], []>} : vector<128x128xbf16>, vector<128x16xbf16>, vector<128x16xf32> -> vector<128x16xf32>
    %c0_27 = arith.constant 0 : index
    %c0_28 = arith.constant 0 : index
    %43 = vector.load %arg11[%c0_27, %c0_28] : memref<1x16xf32, #tpu.memory_space<vmem>>, vector<1x16xf32>
    %44 = vector.broadcast %43 : vector<1x16xf32> to vector<128x16xf32>
    %45 = arith.addf %42, %44 : vector<128x16xf32>
    %cst_29 = arith.constant dense<0xFF800000> : vector<128xf32>
    %46 = vector.multi_reduction <maximumf>, %45, %cst_29 [1] : vector<128x16xf32> to vector<128xf32>
    %47 = vector.shape_cast %46 : vector<128xf32> to vector<128x1xf32>
    %48 = vector.broadcast %47 : vector<128x1xf32> to vector<128x16xf32>
    %49 = arith.subf %45, %48 : vector<128x16xf32>
    %50 = math.exp %49 : vector<128x16xf32>
    %cst_30 = arith.constant dense<0.000000e+00> : vector<128xf32>
    %51 = vector.multi_reduction <add>, %50, %cst_30 [1] : vector<128x16xf32> to vector<128xf32>
    %52 = vector.shape_cast %51 : vector<128xf32> to vector<128x1xf32>
    %53 = math.log %52 : vector<128x1xf32>
    %54 = vector.broadcast %53 : vector<128x1xf32> to vector<128x16xf32>
    %55 = arith.subf %49, %54 : vector<128x16xf32>
    %c0_31 = arith.constant 0 : index
    %c0_32 = arith.constant 0 : index
    %56 = vector.load %arg12[%c0_31, %c0_32] : memref<128x16xf32, #tpu.memory_space<vmem>>, vector<128x16xf32>
    tpu.vector_store %arg12[%c0_31, %c0_32], %55 {strides = array<i32>} : memref<128x16xf32, #tpu.memory_space<vmem>>, vector<128x16xf32>,
    return
  }
  func.func @transform_0(%arg0: i32) -> (i32, i32) {
    %c0_i32 = arith.constant 0 : i32
    %c0_i32_0 = arith.constant 0 : i32
    return %arg0, %c0_i32 : i32, i32
  }
  func.func @transform_1(%arg0: i32) -> (i32, i32) {
    %c0_i32 = arith.constant 0 : i32
    %c0_i32_0 = arith.constant 0 : i32
    %c0_i32_1 = arith.constant 0 : i32
    return %c0_i32, %c0_i32_0 : i32, i32
  }
  func.func @transform_2(%arg0: i32) -> (i32, i32) {
    %c0_i32 = arith.constant 0 : i32
    %c0_i32_0 = arith.constant 0 : i32
    %c0_i32_1 = arith.constant 0 : i32
    return %c0_i32, %c0_i32_0 : i32, i32
  }
  func.func @transform_3(%arg0: i32) -> (i32, i32) {
    %c0_i32 = arith.constant 0 : i32
    %c0_i32_0 = arith.constant 0 : i32
    %c0_i32_1 = arith.constant 0 : i32
    return %c0_i32, %c0_i32_0 : i32, i32
  }
  func.func @transform_4(%arg0: i32) -> (i32, i32) {
    %c0_i32 = arith.constant 0 : i32
    %c0_i32_0 = arith.constant 0 : i32
    %c0_i32_1 = arith.constant 0 : i32
    return %c0_i32, %c0_i32_0 : i32, i32
  }
  func.func @transform_5(%arg0: i32) -> (i32, i32) {
    %c0_i32 = arith.constant 0 : i32
    %c0_i32_0 = arith.constant 0 : i32
    %c0_i32_1 = arith.constant 0 : i32
    return %c0_i32, %c0_i32_0 : i32, i32
  }
  func.func @transform_6(%arg0: i32) -> (i32, i32) {
    %c0_i32 = arith.constant 0 : i32
    %c0_i32_0 = arith.constant 0 : i32
    %c0_i32_1 = arith.constant 0 : i32
    return %c0_i32, %c0_i32_0 : i32, i32
  }
  func.func @transform_7(%arg0: i32) -> (i32, i32) {
    %c0_i32 = arith.constant 0 : i32
    %c0_i32_0 = arith.constant 0 : i32
    %c0_i32_1 = arith.constant 0 : i32
    return %c0_i32, %c0_i32_0 : i32, i32
  }
  func.func @transform_8(%arg0: i32) -> (i32, i32) {
    %c0_i32 = arith.constant 0 : i32
    %c0_i32_0 = arith.constant 0 : i32
    %c0_i32_1 = arith.constant 0 : i32
    return %c0_i32, %c0_i32_0 : i32, i32
  }
  func.func @transform_9(%arg0: i32) -> (i32, i32) {
    %c0_i32 = arith.constant 0 : i32
    %c0_i32_0 = arith.constant 0 : i32
    %c0_i32_1 = arith.constant 0 : i32
    return %c0_i32, %c0_i32_0 : i32, i32
  }
  func.func @transform_10(%arg0: i32) -> (i32, i32) {
    %c0_i32 = arith.constant 0 : i32
    %c0_i32_0 = arith.constant 0 : i32
    %c0_i32_1 = arith.constant 0 : i32
    return %c0_i32, %c0_i32_0 : i32, i32
  }
  func.func @transform_11(%arg0: i32) -> (i32, i32) {
    %c0_i32 = arith.constant 0 : i32
    %c0_i32_0 = arith.constant 0 : i32
    return %arg0, %c0_i32 : i32, i32
  }
}

</mosaic_0001>

<bundles_post_ra>
// kernel: _lambda_.1
= control target key start
LH: loop header
LB: loop body
LE: loop exit
PB: predicated region body
PF: predicated region fallthrough
CT: control target
= control target key end

     0   :  { %s3174_s0 = inlined_call_operand.vmem [shape: bf16[256,32], index: 0, kind: input, shape index: {}]   ;;  %s3175_s1 = inlined_call_operand.hbm [shape: bf16[32,128], index: 1, kind: input, shape index: {}]   ;;  %s3176_s2 = inlined_call_operand.hbm [shape: f32[1,128], index: 2, kind: input, shape index: {}]   ;;  %s3177_s3 = inlined_call_operand.vmem [shape: bf16[128,384], index: 3, kind: input, shape index: {}]   ;;  %s3178_s4 = inlined_call_operand.hbm [shape: f32[1,384], index: 4, kind: input, shape index: {}]   ;;  %s3179_s5 = inlined_call_operand.hbm [shape: bf16[128,256], index: 5, kind: input, shape index: {}]   ;;  %s3180_s6 = inlined_call_operand.vmem [shape: f32[1,256], index: 6, kind: input, shape index: {}]   ;;  %s3181_s7 = inlined_call_operand.hbm [shape: bf16[128,128], index: 7, kind: input, shape index: {}]   ;;  %s3182_s8 = inlined_call_operand.vmem [shape: f32[1,128], index: 8, kind: input, shape index: {}]   ;;  %s3183_s9 = inlined_call_operand.vmem [shape: bf16[128,16], index: 9, kind: input, shape index: {}]   ;;  %s3184_s10 = inlined_call_operand.vmem [shape: f32[1,16], index: 10, kind: input, shape index: {}]   ;;  %s3185_s11 = inlined_call_operand.vmem [shape: f32[256,16], index: 11, kind: output, shape index: {}]  }
   0x1   :  { %3187 = sst [smem:[#allocation13_spill]] %s3175_s1 }
   0x2   :  { %16 = vsyncpa [#allocation3], 0 }
   0x3   :  { %17 = vsyncpa [#allocation5], 0 }
   0x4   :  { %18 = vsyncpa [#allocation8], 0  ;;  %s2556_s17 = smov 0  }
   0x5 LB: > { %s317_s20 = sshll.u32 %s3176_s2, 4  ;;  %s3186_s21 = sadd.s32 4294967295, %s2485_s17   ;;  %s2485_s17 = sphi %s2556_s17, %s24_s17   ;;  %s318_s20 = int_to_ptr.hbm [resolvable:$true] %s317_s20 }
   0x6   : > { %p1830_p0 = scmp.ge.s32.totalorder %s2485_s17, 1  ;;  %p291_p1 = scmp.lt.s32.totalorder %s2485_s17, 3 }
   0x7   : > { %p2569_p2 = scmp.eq.s32.totalorder %s3186_s21, 0  ;;  %s2487_s24 = smov [#allocation4]  }
   0x8   : > { %p2573_p3 = pnand %p1830_p0, %p291_p1  ;;  %s319_s25 = sshll.u32 %s2487_s24, 4  ;;  %s320_s25 = int_to_ptr.vmem [resolvable:$true] %s319_s25 }
   0x9   : > { %s343_s28 = sshll.u32 %s3179_s5, 4  ;;  %s2488_s30 = smov [#allocation7]   ;;  %s344_s28 = int_to_ptr.hbm [resolvable:$true] %s343_s28 }
   0xa   : > { %p2207_p4 = pneg %p2573_p3  ;;  %s345_s12 = sshll.u32 %s2488_s30, 4  ;;  %s346_s12 = int_to_ptr.vmem [resolvable:$true] %s345_s12 }
   0xb   : > { %s3191_s1 = sld [smem:[#allocation13_spill]]  ;;  %s2489_s16 = smov 128  }
   0xc   : > { %p2584_p5 = pnand %p2569_p2, %p2207_p4  ;;  %s2490_s18 = smov 8  }
   0xd   : > { %s2491_s19 = smov [#allocation2]   ;;  %s2492_s26 = smov 64  }
   0xe   : > { %2213 = dma.hbm_to_vmem [thread:$0]  (!%p2584_p5), %s318_s20, 16, %s320_s25, [#allocation5]  }
   0xf   : > { %2219 = dma.hbm_to_vmem [thread:$0]  (!%p2584_p5), %s344_s28, 2048, %s346_s12, [#allocation8], %s2489_s16, %s2489_s16, %s2490_s18  }
  0x10   : > { %s304_s24 = sshll.u32 %s2491_s19, 4  ;;  %s2493_s27 = smov 4   ;;  %s305_s24 = int_to_ptr.vmem [resolvable:$true] %s304_s24 }
  0x11   : > { %s302_s15 = sshll.u32 %s3191_s1, 4  ;;  %s332_s13 = sshll.u32 %s3178_s4, 4  ;;  %s303_s15 = int_to_ptr.hbm [resolvable:$true] %s302_s15  ;;  %s333_s13 = int_to_ptr.hbm [resolvable:$true] %s332_s13 }
  0x12   : > { %2210 = dma.hbm_to_vmem [thread:$0]  (!%p2584_p5), %s303_s15, 256, %s305_s24, [#allocation3], %s2492_s26, %s2492_s26, %s2493_s27  }
  0x13   : > { %s2494_s20 = smov [#allocation6]   ;;  %s360_s28 = sshll.u32 %s3181_s7, 4  ;;  %s361_s28 = int_to_ptr.hbm [resolvable:$true] %s360_s28 }
  0x14   : > { %s334_s25 = sshll.u32 %s2494_s20, 4  ;;  %s2495_s12 = smov [#allocation9]   ;;  %s335_s25 = int_to_ptr.vmem [resolvable:$true] %s334_s25 }
  0x15   : > { %2216 = dma.hbm_to_vmem [thread:$0]  (!%p2584_p5), %s333_s13, 48, %s335_s25, [#allocation5]  }
  0x16   : > { %s362_s16 = sshll.u32 %s2495_s12, 4  ;;  %396 = sbr.rel (%p2573_p3) target bundleno = 1123 (0x463), region = 64  ;;  %s363_s16 = int_to_ptr.vmem [resolvable:$true] %s362_s16 }
  0x17   : > { %2222 = dma.hbm_to_vmem [thread:$0]  (!%p2584_p5), %s361_s28, 1024, %s363_s16, [#allocation8], %s2492_s26, %s2492_s26, %s2493_s27  }
  0x1b   : > { %2472 = dma.done.wait (%p2569_p2), [#allocation3], 256  }
  0x1c   : > { %2474 = vsyncadd (%p2569_p2), [#allocation3], 4294967040 }
  0x1d   : > { %2476 = dma.done.wait (%p2569_p2), [#allocation5], 64  }
  0x1e   : > { %2478 = vsyncadd (%p2569_p2), [#allocation5], 4294967232 }
  0x1f   : > { %2480 = dma.done.wait (%p2569_p2), [#allocation8], 3072  }
  0x20   : > { %2482 = vsyncadd (%p2569_p2), [#allocation8], 4294964224  ;;  %s3192_s1 = sadd.s32 4294967295, %s2485_s17   ;;  %v2130_v0 = vld [vmem:[#allocation2 + $0x8] sm:$0xff]  ;;  %v2129_v1 = vld [vmem:[#allocation2] sm:$0xff]  ;;  %vm546_vm0 = vcmask 261120  }
  0x21   : > { %s1843_s21 = sshll.u32 %s3192_s1, 4  ;;  %577 = vmatpush.bf16.msra.mxu0 %v2130_v0  ;;  %v1981_v7 = vld [vmem:[%s3177_s3 + $0xa8] sm:$0xf]  ;;  %v2153_v8 = vld [vmem:[%s3177_s3 + $0xb0] sm:$0xf0]  ;;  %vm1513_vm1 = vcmask 130048  }
  0x22   : > { %p458_p6 = scmp.lt.s32.totalorder %s1843_s21, 31  ;;  %v2152_v9 = vld [vmem:[%s3177_s3 + $0xac] sm:$0xf]  ;;  %v1982_v10 = vor.u32 %v2153_v8, %v1981_v7  ;;  %v1983_v11 = vld [vmem:[%s3177_s3 + $0xb4] sm:$0xf0] }
  0x23   : > { %v1989_v12 = vld [vmem:[%s3177_s3 + $0xb0] sm:$0xf]  ;;  %v2154_v13 = vld [vmem:[%s3177_s3 + $0xb8] sm:$0xf0]  ;;  %v1986_v14 = vor.u32 %v2152_v9, %v1983_v11  ;;  %v2149_v19 = vld [vmem:[%s3177_s3 + $0x94] sm:$0xf] }
  0x24   : > { %s3194_s21 = smov (!%p458_p6, %s1843_s21), 31  ;;  %v1990_v15 = vor.u32 %v2154_v13, %v1989_v12  ;;  %812 = vmatpush.bf16.msra.mxu1 %v1982_v10  ;;  %v1969_v17 = vld [vmem:[%s3177_s3 + $0x90] sm:$0xf]  ;;  %v2150_v18 = vld [vmem:[%s3177_s3 + $0x98] sm:$0xf0] }
  0x25   : > { %s1844_s23 = sshll.u32 %s3194_s21, 2  ;;  %578 = vmatpush.bf16.msra.mxu0 %v2129_v1  ;;  %861 = vmatpush.bf16.msra.mxu2 %v1986_v14  ;;  %v1970_v20 = vor.u32 %v2150_v18, %v1969_v17  ;;  %v1971_v21 = vld [vmem:[%s3177_s3 + $0x9c] sm:$0xf0]  ;;  %v1977_v22 = vld [vmem:[%s3177_s3 + $0x98] sm:$0xf] }
  0x26   : > { %s2629_s18 = scalar_lea.vmem %s3174_s0, %s1844_s23  ;;  %910 = vmatpush.bf16.msra.mxu3 %v1990_v15  ;;  %v2151_v23 = vld [vmem:[%s3177_s3 + $0xa0] sm:$0xf0]  ;;  %v1974_v24 = vor.u32 %v2149_v19, %v1971_v21  ;;  %v1957_v26 = vld [vmem:[%s3177_s3 + $0x78] sm:$0xf]  ;;  %v2146_v28 = vld [vmem:[%s3177_s3 + $0x7c] sm:$0xf] }
  0x27   : > { %v2121_v2 = vld [vmem:[%s2629_s18] sm:$0xff]  ;;  %v2122_v3 = vld [vmem:[%s2629_s18 + $0x8] sm:$0xff]  ;;  %v2123_v4 = vld [vmem:[%s2629_s18 + $0x10] sm:$0xff]  ;;  %v1978_v25 = vor.u32 %v2151_v23, %v1977_v22  ;;  %s1846_s23 = sshll.u32 %s3194_s21, 3 }
  0x28   : > { %1887 = vmatmul.msk.bf16.vlgmr.msra.gmra.mxu0 %vm546_vm0, %v2121_v2  ;;  %v2124_v5 = vld [vmem:[%s2629_s18 + $0x18] sm:$0xff]  ;;  %v2125_v6 = vld [vmem:[%s2629_s18 + $0x20] sm:$0xff]  ;;  %v2126_v16 = vld [vmem:[%s2629_s18 + $0x28] sm:$0xff]  ;;  %813 = vmatpush.bf16.msra.mxu1 %v1970_v20  ;;  %s3121_s22 = scalar_lea.vmem %s3185_s11, %s1846_s23 }
  0x29   : > { %v2147_v27 = vld [vmem:[%s3177_s3 + $0x80] sm:$0xf0]  ;;  %v1959_v30 = vld [vmem:[%s3177_s3 + $0x84] sm:$0xf0]  ;;  %v1965_v31 = vld [vmem:[%s3177_s3 + $0x80] sm:$0xf]  ;;  %862 = vmatpush.bf16.msra.mxu2 %v1974_v24 }
  0x2a   : > { %v1958_v29 = vor.u32 %v2147_v27, %v1957_v26  ;;  %v2148_v32 = vld [vmem:[%s3177_s3 + $0x88] sm:$0xf0]  ;;  %911 = vmatpush.bf16.msra.mxu3 %v1978_v25  ;;  %v1962_v33 = vor.u32 %v2146_v28, %v1959_v30  ;;  %v1945_v35 = vld [vmem:[%s3177_s3 + $0x60] sm:$0xf]  ;;  %v2143_v37 = vld [vmem:[%s3177_s3 + $0x64] sm:$0xf] }
  0x2b   : > { %v1966_v34 = vor.u32 %v2148_v32, %v1965_v31  ;;  %v2144_v36 = vld [vmem:[%s3177_s3 + $0x68] sm:$0xf0]  ;;  %v1947_v38 = vld [vmem:[%s3177_s3 + $0x6c] sm:$0xf0]  ;;  %v1953_v39 = vld [vmem:[%s3177_s3 + $0x68] sm:$0xf] }
  0x2c   : > { %v2145_v40 = vld [vmem:[%s3177_s3 + $0x70] sm:$0xf0]  ;;  %814 = vmatpush.bf16.msra.mxu1 %v1958_v29  ;;  %v1946_v41 = vor.u32 %v2144_v36, %v1945_v35  ;;  %v1950_v42 = vor.u32 %v2143_v37, %v1947_v38  ;;  %v1933_v44 = vld [vmem:[%s3177_s3 + $0x48] sm:$0xf]  ;;  %v2140_v46 = vld [vmem:[%s3177_s3 + $0x4c] sm:$0xf] }
  0x2d   : > { %863 = vmatpush.bf16.msra.mxu2 %v1962_v33  ;;  %v1954_v43 = vor.u32 %v2145_v40, %v1953_v39  ;;  %v2141_v45 = vld [vmem:[%s3177_s3 + $0x50] sm:$0xf0]  ;;  %v1935_v48 = vld [vmem:[%s3177_s3 + $0x54] sm:$0xf0]  ;;  %v1941_v49 = vld [vmem:[%s3177_s3 + $0x50] sm:$0xf] }
  0x2e   : > { %912 = vmatpush.bf16.msra.mxu3 %v1966_v34  ;;  %v1934_v47 = vor.u32 %v2141_v45, %v1933_v44  ;;  %v2142_v50 = vld [vmem:[%s3177_s3 + $0x58] sm:$0xf0]  ;;  %v2127_v51 = vld [vmem:[%s2629_s18 + $0x30] sm:$0xff]  ;;  %v1938_v52 = vor.u32 %v2140_v46, %v1935_v48  ;;  %v1923_v58 = vld [vmem:[%s3177_s3 + $0x3c] sm:$0xf0] }
  0x2f   : > { %v1942_v53 = vor.u32 %v2142_v50, %v1941_v49  ;;  %v1921_v54 = vld [vmem:[%s3177_s3 + $0x30] sm:$0xf]  ;;  %v2138_v55 = vld [vmem:[%s3177_s3 + $0x38] sm:$0xf0]  ;;  %v2137_v56 = vld [vmem:[%s3177_s3 + $0x34] sm:$0xf] }
  0x30   : > { %815 = vmatpush.bf16.msra.mxu1 %v1946_v41  ;;  %v1922_v57 = vor.u32 %v2138_v55, %v1921_v54  ;;  %v1929_v59 = vld [vmem:[%s3177_s3 + $0x38] sm:$0xf]  ;;  %v2139_v60 = vld [vmem:[%s3177_s3 + $0x40] sm:$0xf0]  ;;  %v1926_v61 = vor.u32 %v2137_v56, %v1923_v58  ;;  %v2134_v1 = vld [vmem:[%s3177_s3 + $0x1c] sm:$0xf] }
  0x31   : > { %864 = vmatpush.bf16.msra.mxu2 %v1950_v42  ;;  %v1930_v62 = vor.u32 %v2139_v60, %v1929_v59  ;;  %v1909_v63 = vld [vmem:[%s3177_s3 + $0x18] sm:$0xf]  ;;  %v2135_v0 = vld [vmem:[%s3177_s3 + $0x20] sm:$0xf0]  ;;  %v1897_v8 = vld [vmem:[%s3177_s3] sm:$0xf] }
  0x32   : > { %913 = vmatpush.bf16.msra.mxu3 %v1954_v43  ;;  %v1910_v2 = vor.u32 %v2135_v0, %v1909_v63  ;;  %v2132_v9 = vld [vmem:[%s3177_s3 + $0x8] sm:$0xf0]  ;;  %v2131_v10 = vld [vmem:[%s3177_s3 + $0x4] sm:$0xf]  ;;  %v1899_v12 = vld [vmem:[%s3177_s3 + $0xc] sm:$0xf0] }
  0x33   : > { %v1898_v11 = vor.u32 %v2132_v9, %v1897_v8  ;;  %v1905_v13 = vld [vmem:[%s3177_s3 + $0x8] sm:$0xf]  ;;  %v2133_v14 = vld [vmem:[%s3177_s3 + $0x10] sm:$0xf0]  ;;  %v1902_v15 = vor.u32 %v2131_v10, %v1899_v12  ;;  %v2128_v17 = vld [vmem:[%s2629_s18 + $0x38] sm:$0xff] }
  0x34   : > { %816 = vmatpush.bf16.msra.mxu1 %v1934_v47  ;;  %v2049_v18 = vld [vmem:[#allocation7 + $0x70] sm:$0xf]  ;;  %v2170_v19 = vld [vmem:[#allocation7 + $0x74] sm:$0xf0]  ;;  %v2041_v28 = vld [vmem:[#allocation7 + $0x60] sm:$0xf] }
  0x35   : > { %865 = vmatpush.bf16.msra.mxu2 %v1938_v52  ;;  %v2050_v20 = vor.u32 %v2170_v19, %v2049_v18  ;;  %v2791_v22 = vld [vmem:[#allocation4] ss:$0 sm:$0xff]  ;;  %v2168_v29 = vld [vmem:[#allocation7 + $0x64] sm:$0xf0]  ;;  %v2033_v38 = vld [vmem:[#allocation7 + $0x50] sm:$0xf] }
  0x36   : > { %914 = vmatpush.bf16.msra.mxu3 %v1942_v53  ;;  %v2042_v30 = vor.u32 %v2168_v29, %v2041_v28  ;;  %v2166_v39 = vld [vmem:[#allocation7 + $0x54] sm:$0xf0]  ;;  %v2025_v49 = vld [vmem:[#allocation7 + $0x40] sm:$0xf]  ;;  %v2164_v50 = vld [vmem:[#allocation7 + $0x44] sm:$0xf0] }
  0x37   : > { %1085 = vmatpush.bf16.msrb.mxu0 %v2050_v20  ;;  %v2034_v40 = vor.u32 %v2166_v39, %v2033_v38  ;;  %v2017_v59 = vld [vmem:[#allocation7 + $0x30] sm:$0xf]  ;;  %v2162_v60 = vld [vmem:[#allocation7 + $0x34] sm:$0xf0]  ;;  %v2169_v12 = vld [vmem:[#allocation7 + $0x74] sm:$0xf] }
  0x38   : > { %1888 = vmatmul.msk.bf16.gmra.mxu0 %vm546_vm0, %v2122_v3  ;;  %817 = vmatpush.bf16.msra.mxu1 %v1922_v57  ;;  %v1911_v3 = vld [vmem:[%s3177_s3 + $0x24] sm:$0xf0]  ;;  %v2158_v19 = vld [vmem:[#allocation7 + $0x14] sm:$0xf0]  ;;  %v1993_v29 = vld [vmem:[#allocation7] sm:$0xf] }
  0x39   : > { %866 = vmatpush.bf16.msra.mxu2 %v1926_v61  ;;  %v2018_v61 = vor.u32 %v2162_v60, %v2017_v59  ;;  %v2001_v18 = vld [vmem:[#allocation7 + $0x10] sm:$0xf]  ;;  %v2161_v38 = vld [vmem:[#allocation7 + $0x34] sm:$0xf]  ;;  %v2019_v39 = vld [vmem:[#allocation7 + $0x38] sm:$0xf0] }
  0x3a   : > { %915 = vmatpush.bf16.msra.mxu3 %v1930_v62  ;;  %v2002_v20 = vor.u32 %v2158_v19, %v2001_v18  ;;  %v2178_v60 = vld [vmem:[#allocation9 + $0x38] sm:$0xff] }
  0x3b   : > { %1086 = vmatpush.bf16.msrb.mxu0 %v2042_v30  ;;  %v2156_v30 = vld [vmem:[#allocation7 + $0x4] sm:$0xf0] }
  0x3c   : > { %818 = vmatpush.bf16.msra.mxu1 %v1910_v2 }
  0x3f   : > { %1087 = vmatpush.bf16.msrb.mxu0 %v2034_v40 }
  0x40   : > { %819 = vmatpush.bf16.msra.mxu1 %v1898_v11 }
  0x48   : > { %1889 = vmatmul.msk.bf16.gmra.mxu0 %vm546_vm0, %v2123_v4  ;;  %v1917_v4 = vld [vmem:[%s3177_s3 + $0x20] sm:$0xf] }
  0x58   : > { %1890 = vmatmul.msk.bf16.gmra.mxu0 %vm546_vm0, %v2124_v5  ;;  %v2136_v5 = vld [vmem:[%s3177_s3 + $0x28] sm:$0xf0] }
  0x59   : > { %v1918_v7 = vor.u32 %v2136_v5, %v1917_v4  ;;  %v2009_v5 = vld [vmem:[#allocation7 + $0x20] sm:$0xf] }
  0x5b   : > { %916 = vmatpush.bf16.msra.mxu3 %v1918_v7 }
  0x68   : > { %1891 = vmatmul.msk.bf16.gmra.mxu0 %vm546_vm0, %v2125_v6  ;;  %v1914_v6 = vor.u32 %v2134_v1, %v1911_v3 }
  0x6a   : > { %867 = vmatpush.bf16.msra.mxu2 %v1914_v6  ;;  %v2160_v6 = vld [vmem:[#allocation7 + $0x24] sm:$0xf0] }
  0x6b   : > { %v2010_v7 = vor.u32 %v2160_v6, %v2009_v5 }
  0x6e   : > { %868 = vmatpush.bf16.msra.mxu2 %v1902_v15 }
  0x72   : > { %1291 = vmatpush.bf16.msrb.mxu2 %v2178_v60 }
  0x78   : > { %1892 = vmatmul.msk.bf16.gmra.mxu0 %vm546_vm0, %v2126_v16  ;;  %v1906_v16 = vor.u32 %v2133_v14, %v1905_v13  ;;  %v2051_v13 = vld [vmem:[#allocation7 + $0x78] sm:$0xf0] }
  0x7a   : > { %917 = vmatpush.bf16.msra.mxu3 %v1906_v16  ;;  %v2054_v16 = vor.u32 %v2169_v12, %v2051_v13  ;;  %v2176_v12 = vld [vmem:[#allocation9 + $0x28] sm:$0xff] }
  0x7c   : > { %1134 = vmatpush.bf16.msrb.mxu1 %v2054_v16 }
  0x88   : > { %1893 = vmatmul.msk.bf16.gmra.mxu0 %vm546_vm0, %v2127_v51  ;;  %v2026_v51 = vor.u32 %v2164_v50, %v2025_v49  ;;  %v2003_v49 = vld [vmem:[#allocation7 + $0x18] sm:$0xf0] }
  0x8a   : > { %1088 = vmatpush.bf16.msrb.mxu0 %v2026_v51  ;;  %v2155_v51 = vld [vmem:[#allocation7 + $0x4] sm:$0xf] }
  0x8e   : > { %1089 = vmatpush.bf16.msrb.mxu0 %v2018_v61  ;;  %v2809_v61 = vld [vmem:[#allocation6] sm:$0x7] }
  0x92   : > { %1090 = vmatpush.bf16.msrb.mxu0 %v2010_v7 }
  0x96   : > { %1091 = vmatpush.bf16.msrb.mxu0 %v2002_v20 }
  0x98   : > { %1894 = vmatmul.msk.bf16.gmra.mxu0 %vm546_vm0, %v2128_v17 }
  0xa5   : > { %v580_v21 = vpop.f32.mrf.mxu0 }
  0xa6   : > { %v581_v23 = vadd.f32 %v2791_v22, %v580_v21  ;;  %v2167_v21 = vld [vmem:[#allocation7 + $0x64] sm:$0xf] }
  0xa8   : > { %v620_v26 = vmax.f32 %v581_v23, 0.0  ;;  %v2043_v23 = vld [vmem:[#allocation7 + $0x68] sm:$0xf0] }
  0xad   : > { %v582_v24 = vpop.f32.mrf.mxu0 }
  0xae   : > { %v583_v25 = vadd.f32 %v2791_v22, %v582_v24  ;;  %v2046_v24 = vor.u32 %v2167_v21, %v2043_v23  ;;  %v2175_v21 = vld [vmem:[#allocation9 + $0x20] sm:$0xff] }
  0xb0   : > { %v621_v27 = vmax.f32 %v583_v25, 0.0  ;;  %1135 = vmatpush.bf16.msrb.mxu1 %v2046_v24 }
  0xb2   : > { %v668_v31 = vpack.c.bf16 %v621_v27, %v620_v26  ;;  %v2165_v26 = vld [vmem:[#allocation7 + $0x54] sm:$0xf]  ;;  %v2035_v27 = vld [vmem:[#allocation7 + $0x58] sm:$0xf0] }
  0xb3   : > { %v2038_v28 = vor.u32 %v2165_v26, %v2035_v27 }
  0xb4   : > { %820 = vmatmul.bf16.vlgmr.msra.gmra.mxu1 %v668_v31  ;;  %869 = vmatmul.bf16.vlgmr.msra.gmra.mxu2 %v668_v31 }
  0xb5   : > { %918 = vmatmul.bf16.vlgmr.msra.gmra.mxu3 %v668_v31  ;;  %v585_v32 = vpop.f32.mrf.mxu0  ;;  %v2163_v31 = vld [vmem:[#allocation7 + $0x44] sm:$0xf]  ;;  %1136 = vmatpush.bf16.msrb.mxu1 %v2038_v28 }
  0xb6   : > { %v586_v33 = vadd.f32 %v2791_v22, %v585_v32  ;;  %v2027_v32 = vld [vmem:[#allocation7 + $0x48] sm:$0xf0] }
  0xb8   : > { %v622_v36 = vmax.f32 %v586_v33, 0.0  ;;  %v1994_v33 = vor.u32 %v2156_v30, %v1993_v29  ;;  %v2174_v30 = vld [vmem:[#allocation9 + $0x18] sm:$0xff] }
  0xba   : > { %1092 = vmatpush.bf16.msrb.mxu0 %v1994_v33 }
  0xbd   : > { %v587_v34 = vpop.f32.mrf.mxu0 }
  0xbe   : > { %v588_v35 = vadd.f32 %v2791_v22, %v587_v34  ;;  %v2030_v34 = vor.u32 %v2163_v31, %v2027_v32 }
  0xc0   : > { %v623_v37 = vmax.f32 %v588_v35, 0.0  ;;  %1137 = vmatpush.bf16.msrb.mxu1 %v2030_v34 }
  0xc2   : > { %v669_v41 = vpack.c.bf16 %v623_v37, %v622_v36 }
  0xc4   : > { %825 = vmatmul.bf16.gmra.mxu1 %v669_v41  ;;  %874 = vmatmul.bf16.gmra.mxu2 %v669_v41 }
  0xc5   : > { %923 = vmatmul.bf16.gmra.mxu3 %v669_v41  ;;  %v590_v42 = vpop.f32.mrf.mxu0 }
  0xc6   : > { %v591_v43 = vadd.f32 %v2791_v22, %v590_v42  ;;  %v2022_v42 = vor.u32 %v2161_v38, %v2019_v39  ;;  %v2173_v38 = vld [vmem:[#allocation9 + $0x10] sm:$0xff] }
  0xc8   : > { %v624_v46 = vmax.f32 %v591_v43, 0.0  ;;  %1138 = vmatpush.bf16.msrb.mxu1 %v2022_v42 }
  0xcd   : > { %v592_v44 = vpop.f32.mrf.mxu0 }
  0xce   : > { %v593_v45 = vadd.f32 %v2791_v22, %v592_v44  ;;  %v2159_v44 = vld [vmem:[#allocation7 + $0x24] sm:$0xf] }
  0xd0   : > { %v625_v47 = vmax.f32 %v593_v45, 0.0  ;;  %v2011_v45 = vld [vmem:[#allocation7 + $0x28] sm:$0xf0] }
  0xd2   : > { %v670_v48 = vpack.c.bf16 %v625_v47, %v624_v46  ;;  %v2014_v46 = vor.u32 %v2159_v44, %v2011_v45 }
  0xd4   : > { %830 = vmatmul.bf16.gmra.mxu1 %v670_v48  ;;  %879 = vmatmul.bf16.gmra.mxu2 %v670_v48 }
  0xd5   : > { %928 = vmatmul.bf16.gmra.mxu3 %v670_v48  ;;  %v595_v52 = vpop.f32.mrf.mxu0  ;;  %1139 = vmatpush.bf16.msrb.mxu1 %v2014_v46  ;;  %v2157_v48 = vld [vmem:[#allocation7 + $0x14] sm:$0xf]  ;;  %v2172_v46 = vld [vmem:[#allocation9 + $0x8] sm:$0xff] }
  0xd6   : > { %v596_v53 = vadd.f32 %v2791_v22, %v595_v52  ;;  %v2006_v50 = vor.u32 %v2157_v48, %v2003_v49  ;;  %v1995_v52 = vld [vmem:[#allocation7 + $0x8] sm:$0xf0] }
  0xd8   : > { %v626_v56 = vmax.f32 %v596_v53, 0.0 }
  0xd9   : > { %1140 = vmatpush.bf16.msrb.mxu1 %v2006_v50 }
  0xdd   : > { %v597_v54 = vpop.f32.mrf.mxu0 }
  0xde   : > { %v598_v55 = vadd.f32 %v2791_v22, %v597_v54  ;;  %v1998_v54 = vor.u32 %v2155_v51, %v1995_v52 }
  0xe0   : > { %v627_v57 = vmax.f32 %v598_v55, 0.0  ;;  %1141 = vmatpush.bf16.msrb.mxu1 %v1998_v54 }
  0xe2   : > { %v671_v58 = vpack.c.bf16 %v627_v57, %v626_v56 }
  0xe4   : > { %835 = vmatmul.bf16.gmra.mxu1 %v671_v58  ;;  %884 = vmatmul.bf16.gmra.mxu2 %v671_v58 }
  0xe5   : > { %933 = vmatmul.bf16.gmra.mxu3 %v671_v58  ;;  %v600_v62 = vpop.f32.mrf.mxu0 }
  0xe6   : > { %v601_v63 = vadd.f32 %v2791_v22, %v600_v62 }
  0xe8   : > { %v628_v2 = vmax.f32 %v601_v63, 0.0  ;;  %v2812_v63 = vperm.slane %v2809_v61, 0 }
  0xed   : > { %v602_v0 = vpop.f32.mrf.mxu0 }
  0xee   : > { %v603_v1 = vadd.f32 %v2791_v22, %v602_v0 }
  0xf0   : > { %v629_v3 = vmax.f32 %v603_v1, 0.0 }
  0xf2   : > { %v672_v4 = vpack.c.bf16 %v629_v3, %v628_v2 }
  0xf4   : > { %840 = vmatmul.bf16.gmra.mxu1 %v672_v4  ;;  %889 = vmatmul.bf16.gmra.mxu2 %v672_v4 }
  0xf5   : > { %938 = vmatmul.bf16.gmra.mxu3 %v672_v4  ;;  %v605_v8 = vpop.f32.mrf.mxu0  ;;  %v2177_v4 = vld [vmem:[#allocation9 + $0x30] sm:$0xff] }
  0xf6   : > { %v606_v9 = vadd.f32 %v2791_v22, %v605_v8  ;;  %1292 = vmatpush.bf16.msrb.mxu2 %v2177_v4 }
  0xf8   : > { %v630_v14 = vmax.f32 %v606_v9, 0.0 }
  0xfa   : > { %1293 = vmatpush.bf16.msrb.mxu2 %v2176_v12 }
  0xfd   : > { %v607_v10 = vpop.f32.mrf.mxu0 }
  0xfe   : > { %v608_v11 = vadd.f32 %v2791_v22, %v607_v10  ;;  %1294 = vmatpush.bf16.msrb.mxu2 %v2175_v21  ;;  %v2185_v21 = vld [vmem:[%s3183_s9 + $0x30] sm:$0xff] }
 0x100   : > { %v631_v15 = vmax.f32 %v608_v11, 0.0 }
 0x102   : > { %v673_v17 = vpack.c.bf16 %v631_v15, %v630_v14  ;;  %1295 = vmatpush.bf16.msrb.mxu2 %v2174_v30 }
 0x104   : > { %845 = vmatmul.bf16.gmra.mxu1 %v673_v17  ;;  %894 = vmatmul.bf16.gmra.mxu2 %v673_v17 }
 0x105   : > { %943 = vmatmul.bf16.gmra.mxu3 %v673_v17  ;;  %v610_v25 = vpop.f32.mrf.mxu0 }
 0x106   : > { %v611_v35 = vadd.f32 %v2791_v22, %v610_v25  ;;  %1296 = vmatpush.bf16.msrb.mxu2 %v2173_v38 }
 0x108   : > { %v632_v40 = vmax.f32 %v611_v35, 0.0 }
 0x10a   : > { %1297 = vmatpush.bf16.msrb.mxu2 %v2172_v46 }
 0x10d   : > { %v612_v36 = vpop.f32.mrf.mxu0 }
 0x10e   : > { %v613_v37 = vadd.f32 %v2791_v22, %v612_v36 }
 0x110   : > { %v633_v41 = vmax.f32 %v613_v37, 0.0 }
 0x112   : > { %v674_v43 = vpack.c.bf16 %v633_v41, %v632_v40 }
 0x114   : > { %850 = vmatmul.bf16.gmra.mxu1 %v674_v43  ;;  %899 = vmatmul.bf16.gmra.mxu2 %v674_v43 }
 0x115   : > { %948 = vmatmul.bf16.gmra.mxu3 %v674_v43  ;;  %v615_v47 = vpop.f32.mrf.mxu0 }
 0x116   : > { %v616_v53 = vadd.f32 %v2791_v22, %v615_v47 }
 0x118   : > { %v634_v57 = vmax.f32 %v616_v53, 0.0 }
 0x11d   : > { %v617_v55 = vpop.f32.mrf.mxu0 }
 0x11e   : > { %v618_v56 = vadd.f32 %v2791_v22, %v617_v55 }
 0x120   : > { %v635_v58 = vmax.f32 %v618_v56, 0.0  ;;  %v2171_v56 = vld [vmem:[#allocation9] sm:$0xff] }
 0x121   : > { %1298 = vmatpush.bf16.msrb.mxu2 %v2171_v56 }
 0x122   : > { %v675_v59 = vpack.c.bf16 %v635_v58, %v634_v57 }
 0x124   : > { %855 = vmatmul.bf16.gmra.mxu1 %v675_v59  ;;  %904 = vmatmul.bf16.gmra.mxu2 %v675_v59 }
 0x125   : > { %953 = vmatmul.bf16.gmra.mxu3 %v675_v59 }
 0x131   : > { %v821_v62 = vpop.f32.mrf.mxu1 }
 0x132   : > { %v822_v0 = vadd.f32 %v821_v62, %v2812_v63 }
 0x134   : > { %v959_v2 = vmax.f32 %v822_v0, 0.0 }
 0x137   : > { %v870_v53 = vpop.f32.mrf.mxu2 }
 0x139   : > { %v823_v1 = vpop.f32.mrf.mxu1 }
 0x13a   : > { %v824_v22 = vadd.f32 %v823_v1, %v2812_v63 }
 0x13c   : > { %v960_v3 = vmax.f32 %v824_v22, 0.0 }
 0x13e   : > { %v991_v5 = vpack.c.bf16 %v960_v3, %v959_v2  ;;  %v2833_v3 = vld [vmem:[%s3180_s6] sm:$0x3] }
 0x13f   : > { %v872_v57 = vpop.f32.mrf.mxu2 }
 0x140   : > { %1093 = vmatmul.bf16.vlgmr.msrb.gmra.mxu0 %v991_v5  ;;  %1142 = vmatmul.bf16.vlgmr.msrb.gmra.mxu1 %v991_v5  ;;  %v2836_v5 = vperm.slane %v2833_v3, 0 }
 0x141   : > { %v826_v6 = vpop.f32.mrf.mxu1 }
 0x142   : > { %v827_v7 = vadd.f32 %v826_v6, %v2812_v63  ;;  %v2839_v6 = vperm.slane %v2809_v61, 1 }
 0x144   : > { %v961_v10 = vmax.f32 %v827_v7, 0.0  ;;  %v2186_v7 = vld [vmem:[%s3183_s9 + $0x38] sm:$0xff] }
 0x145   : > { %1464 = vmatpush.bf16.msrb.mxu3 %v2186_v7 }
 0x147   : > { %v875_v22 = vpop.f32.mrf.mxu2 }
 0x149   : > { %v828_v8 = vpop.f32.mrf.mxu1  ;;  %1465 = vmatpush.bf16.msrb.mxu3 %v2185_v21 }
 0x14a   : > { %v829_v9 = vadd.f32 %v828_v8, %v2812_v63  ;;  %v871_v8 = vadd.f32 %v870_v53, %v2839_v6 }
 0x14c   : > { %v962_v11 = vmax.f32 %v829_v9, 0.0 }
 0x14e   : > { %v992_v13 = vpack.c.bf16 %v962_v11, %v961_v10  ;;  %v873_v11 = vadd.f32 %v872_v57, %v2839_v6 }
 0x14f   : > { %v877_v2 = vpop.f32.mrf.mxu2 }
 0x150   : > { %1098 = vmatmul.bf16.gmra.mxu0 %v992_v13  ;;  %1147 = vmatmul.bf16.gmra.mxu1 %v992_v13 }
 0x151   : > { %v831_v14 = vpop.f32.mrf.mxu1 }
 0x152   : > { %v832_v15 = vadd.f32 %v831_v14, %v2812_v63 }
 0x154   : > { %v963_v18 = vmax.f32 %v832_v15, 0.0 }
 0x157   : > { %v880_v9 = vpop.f32.mrf.mxu2 }
 0x159   : > { %v833_v16 = vpop.f32.mrf.mxu1 }
 0x15a   : > { %v834_v17 = vadd.f32 %v833_v16, %v2812_v63 }
 0x15c   : > { %v964_v19 = vmax.f32 %v834_v17, 0.0 }
 0x15e   : > { %v993_v20 = vpack.c.bf16 %v964_v19, %v963_v18 }
 0x15f   : > { %v882_v19 = vpop.f32.mrf.mxu2 }
 0x160   : > { %1103 = vmatmul.bf16.gmra.mxu0 %v993_v20  ;;  %1152 = vmatmul.bf16.gmra.mxu1 %v993_v20 }
 0x161   : > { %v836_v23 = vpop.f32.mrf.mxu1 }
 0x162   : > { %v837_v24 = vadd.f32 %v836_v23, %v2812_v63  ;;  %v876_v23 = vadd.f32 %v875_v22, %v2839_v6 }
 0x164   : > { %v965_v27 = vmax.f32 %v837_v24, 0.0 }
 0x169   : > { %v838_v25 = vpop.f32.mrf.mxu1 }
 0x16a   : > { %v839_v26 = vadd.f32 %v838_v25, %v2812_v63  ;;  %v878_v25 = vadd.f32 %v877_v2, %v2839_v6 }
 0x16c   : > { %v966_v28 = vmax.f32 %v839_v26, 0.0 }
 0x16e   : > { %v994_v29 = vpack.c.bf16 %v966_v28, %v965_v27 }
 0x170   : > { %1108 = vmatmul.bf16.gmra.mxu0 %v994_v29  ;;  %1157 = vmatmul.bf16.gmra.mxu1 %v994_v29  ;;  %v885_v29 = vpop.f32.mrf.mxu2 }
 0x171   : > { %v841_v31 = vpop.f32.mrf.mxu1 }
 0x172   : > { %v842_v32 = vadd.f32 %v841_v31, %v2812_v63 }
 0x174   : > { %v967_v35 = vmax.f32 %v842_v32, 0.0 }
 0x179   : > { %v843_v33 = vpop.f32.mrf.mxu1 }
 0x17a   : > { %v844_v34 = vadd.f32 %v843_v33, %v2812_v63 }
 0x17c   : > { %v968_v36 = vmax.f32 %v844_v34, 0.0 }
 0x17e   : > { %v995_v37 = vpack.c.bf16 %v968_v36, %v967_v35  ;;  %v2184_v35 = vld [vmem:[%s3183_s9 + $0x28] sm:$0xff]  ;;  %v887_v36 = vpop.f32.mrf.mxu2 }
 0x17f   : > { %1466 = vmatpush.bf16.msrb.mxu3 %v2184_v35 }
 0x180   : > { %1113 = vmatmul.bf16.gmra.mxu0 %v995_v37  ;;  %1162 = vmatmul.bf16.gmra.mxu1 %v995_v37  ;;  %v881_v37 = vadd.f32 %v880_v9, %v2839_v6 }
 0x181   : > { %v846_v39 = vpop.f32.mrf.mxu1 }
 0x182   : > { %v847_v40 = vadd.f32 %v846_v39, %v2812_v63  ;;  %v883_v39 = vadd.f32 %v882_v19, %v2839_v6 }
 0x184   : > { %v969_v43 = vmax.f32 %v847_v40, 0.0 }
 0x186   : > { %v890_v46 = vpop.f32.mrf.mxu2 }
 0x187   : > { %v891_v22 = vadd.f32 %v890_v46, %v2839_v6 }
 0x189   : > { %v848_v41 = vpop.f32.mrf.mxu1 }
 0x18a   : > { %v849_v42 = vadd.f32 %v848_v41, %v2812_v63 }
 0x18c   : > { %v970_v44 = vmax.f32 %v849_v42, 0.0 }
 0x18e   : > { %v996_v45 = vpack.c.bf16 %v970_v44, %v969_v43 }
 0x190   : > { %1118 = vmatmul.bf16.gmra.mxu0 %v996_v45  ;;  %1167 = vmatmul.bf16.gmra.mxu1 %v996_v45 }
 0x191   : > { %v851_v47 = vpop.f32.mrf.mxu1 }
 0x192   : > { %v852_v48 = vadd.f32 %v851_v47, %v2812_v63 }
 0x194   : > { %v971_v51 = vmax.f32 %v852_v48, 0.0 }
 0x199   : > { %v853_v49 = vpop.f32.mrf.mxu1 }
 0x19a   : > { %v854_v50 = vadd.f32 %v853_v49, %v2812_v63  ;;  %v2183_v49 = vld [vmem:[%s3183_s9 + $0x20] sm:$0xff] }
 0x19b   : > { %1467 = vmatpush.bf16.msrb.mxu3 %v2183_v49 }
 0x19c   : > { %v972_v52 = vmax.f32 %v854_v50, 0.0  ;;  %v886_v50 = vadd.f32 %v885_v29, %v2839_v6 }
 0x19e   : > { %v997_v54 = vpack.c.bf16 %v972_v52, %v971_v51  ;;  %v888_v52 = vadd.f32 %v887_v36, %v2839_v6 }
 0x1a0   : > { %1123 = vmatmul.bf16.gmra.mxu0 %v997_v54  ;;  %1172 = vmatmul.bf16.gmra.mxu1 %v997_v54 }
 0x1a1   : > { %v856_v55 = vpop.f32.mrf.mxu1 }
 0x1a2   : > { %v857_v58 = vadd.f32 %v856_v55, %v2812_v63  ;;  %v892_v55 = vpop.f32.mrf.mxu2 }
 0x1a4   : > { %v973_v62 = vmax.f32 %v857_v58, 0.0 }
 0x1a9   : > { %v858_v59 = vpop.f32.mrf.mxu1 }
 0x1aa   : > { %v859_v60 = vadd.f32 %v858_v59, %v2812_v63 }
 0x1ac   : > { %v974_v0 = vmax.f32 %v859_v60, 0.0 }
 0x1ae   : > { %v998_v1 = vpack.c.bf16 %v974_v0, %v973_v62  ;;  %v895_v62 = vpop.f32.mrf.mxu2 }
 0x1b0   : > { %1128 = vmatmul.bf16.gmra.mxu0 %v998_v1  ;;  %1177 = vmatmul.bf16.gmra.mxu1 %v998_v1  ;;  %v2182_v1 = vld [vmem:[%s3183_s9 + $0x18] sm:$0xff] }
 0x1b1   : > { %1468 = vmatpush.bf16.msrb.mxu3 %v2182_v1 }
 0x1bd   : > { %v1094_v4 = vpop.f32.mrf.mxu0 }
 0x1be   : > { %v1095_v63 = vadd.f32 %v1094_v4, %v2836_v5  ;;  %v893_v4 = vadd.f32 %v892_v55, %v2839_v6 }
 0x1c0   : > { %v1183_v12 = vadd.f32 %v1095_v63, %v871_v8 }
 0x1c2   : > { %v1199_v15 = vmax.f32 %v1183_v12, 0.0 }
 0x1c5   : > { %v1096_v10 = vpop.f32.mrf.mxu0 }
 0x1c6   : > { %v1097_v13 = vadd.f32 %v1096_v10, %v2836_v5 }
 0x1c8   : > { %v1184_v14 = vadd.f32 %v1097_v13, %v873_v11  ;;  %v897_v11 = vpop.f32.mrf.mxu2 }
 0x1c9   : > { %v898_v19 = vadd.f32 %v897_v11, %v2839_v6 }
 0x1ca   : > { %v1200_v16 = vmax.f32 %v1184_v14, 0.0 }
 0x1cc   : > { %v1231_v17 = vpack.c.bf16 %v1200_v16, %v1199_v15  ;;  %v2181_v15 = vld [vmem:[%s3183_s9 + $0x10] sm:$0xff]  ;;  %v896_v16 = vadd.f32 %v895_v62, %v2839_v6 }
 0x1cd   : > { %v1099_v18 = vpop.f32.mrf.mxu0  ;;  %1469 = vmatpush.bf16.msrb.mxu3 %v2181_v15 }
 0x1ce   : > { %1299 = vmatmul.bf16.vlgmr.msrb.gmra.mxu2 %v1231_v17  ;;  %v1100_v20 = vadd.f32 %v1099_v18, %v2836_v5 }
 0x1d0   : > { %v1185_v26 = vadd.f32 %v1100_v20, %v876_v23  ;;  %v900_v17 = vpop.f32.mrf.mxu2 }
 0x1d2   : > { %v1201_v30 = vmax.f32 %v1185_v26, 0.0 }
 0x1d5   : > { %v1101_v24 = vpop.f32.mrf.mxu0 }
 0x1d6   : > { %v1102_v27 = vadd.f32 %v1101_v24, %v2836_v5 }
 0x1d8   : > { %v1186_v28 = vadd.f32 %v1102_v27, %v878_v25  ;;  %v902_v29 = vpop.f32.mrf.mxu2 }
 0x1da   : > { %v1202_v31 = vmax.f32 %v1186_v28, 0.0  ;;  %v2180_v28 = vld [vmem:[%s3183_s9 + $0x8] sm:$0xff] }
 0x1db   : > { %1470 = vmatpush.bf16.msrb.mxu3 %v2180_v28 }
 0x1dc   : > { %v1232_v32 = vpack.c.bf16 %v1202_v31, %v1201_v30  ;;  %v901_v31 = vadd.f32 %v900_v17, %v2839_v6 }
 0x1dd   : > { %v1104_v33 = vpop.f32.mrf.mxu0 }
 0x1de   : > { %1304 = vmatmul.bf16.gmra.mxu2 %v1232_v32  ;;  %v1105_v34 = vadd.f32 %v1104_v33, %v2836_v5  ;;  %v903_v33 = vadd.f32 %v902_v29, %v2839_v6 }
 0x1e0   : > { %v1187_v40 = vadd.f32 %v1105_v34, %v881_v37  ;;  %v905_v37 = vpop.f32.mrf.mxu2 }
 0x1e1   : > { %v906_v46 = vadd.f32 %v905_v37, %v2839_v6 }
 0x1e2   : > { %v1203_v43 = vmax.f32 %v1187_v40, 0.0 }
 0x1e5   : > { %v1106_v38 = vpop.f32.mrf.mxu0 }
 0x1e6   : > { %v1107_v41 = vadd.f32 %v1106_v38, %v2836_v5 }
 0x1e8   : > { %v1188_v42 = vadd.f32 %v1107_v41, %v883_v39 }
 0x1ea   : > { %v1204_v44 = vmax.f32 %v1188_v42, 0.0  ;;  %v919_v42 = vpop.f32.mrf.mxu3 }
 0x1ec   : > { %v1233_v45 = vpack.c.bf16 %v1204_v44, %v1203_v43  ;;  %v907_v44 = vpop.f32.mrf.mxu2 }
 0x1ed   : > { %v1109_v47 = vpop.f32.mrf.mxu0 }
 0x1ee   : > { %1309 = vmatmul.bf16.gmra.mxu2 %v1233_v45  ;;  %v1110_v48 = vadd.f32 %v1109_v47, %v2836_v5  ;;  %v1143_v45 = vpop.f32.mrf.mxu1 }
 0x1f0   : > { %v1189_v53 = vadd.f32 %v1110_v48, %v886_v50  ;;  %v908_v48 = vadd.f32 %v907_v44, %v2839_v6  ;;  %v2900_v6 = vld [vmem:[%s3182_s8] ss:$0 sm:$0xff] }
 0x1f2   : > { %v1205_v57 = vmax.f32 %v1189_v53, 0.0  ;;  %v921_v55 = vpop.f32.mrf.mxu3 }
 0x1f5   : > { %v1111_v51 = vpop.f32.mrf.mxu0 }
 0x1f6   : > { %v1112_v54 = vadd.f32 %v1111_v51, %v2836_v5 }
 0x1f8   : > { %v1190_v56 = vadd.f32 %v1112_v54, %v888_v52  ;;  %v2179_v52 = vld [vmem:[%s3183_s9] sm:$0xff] }
 0x1f9   : > { %1471 = vmatpush.bf16.msrb.mxu3 %v2179_v52 }
 0x1fa   : > { %v1206_v58 = vmax.f32 %v1190_v56, 0.0 }
 0x1fc   : > { %v1234_v59 = vpack.c.bf16 %v1206_v58, %v1205_v57  ;;  %v1145_v57 = vpop.f32.mrf.mxu1  ;;  %v924_v58 = vpop.f32.mrf.mxu3 }
 0x1fd   : > { %v1114_v60 = vpop.f32.mrf.mxu0 }
 0x1fe   : > { %1314 = vmatmul.bf16.gmra.mxu2 %v1234_v59  ;;  %v1115_v0 = vadd.f32 %v1114_v60, %v2836_v5 }
 0x200   : > { %v1191_v63 = vadd.f32 %v1115_v0, %v891_v22  ;;  %v2903_v0 = vperm.slane %v2809_v61, 2 }
 0x202   : > { %v1207_v9 = vmax.f32 %v1191_v63, 0.0  ;;  %v920_v22 = vadd.f32 %v919_v42, %v2903_v0 }
 0x204   : > { %v1148_v59 = vpop.f32.mrf.mxu1  ;;  %v926_v60 = vpop.f32.mrf.mxu3 }
 0x205   : > { %v1116_v2 = vpop.f32.mrf.mxu0 }
 0x206   : > { %v1117_v7 = vadd.f32 %v1116_v2, %v2836_v5  ;;  %v2908_v2 = vperm.slane %v2833_v3, 1 }
 0x208   : > { %v1192_v8 = vadd.f32 %v1117_v7, %v893_v4  ;;  %v1146_v61 = vadd.f32 %v1145_v57, %v2908_v2 }
 0x20a   : > { %v1208_v10 = vmax.f32 %v1192_v8, 0.0  ;;  %v922_v8 = vadd.f32 %v921_v55, %v2903_v0 }
 0x20c   : > { %v1235_v12 = vpack.c.bf16 %v1208_v10, %v1207_v9  ;;  %v929_v63 = vpop.f32.mrf.mxu3  ;;  %v1144_v9 = vadd.f32 %v1143_v45, %v2908_v2 }
 0x20d   : > { %v1119_v13 = vpop.f32.mrf.mxu0 }
 0x20e   : > { %1319 = vmatmul.bf16.gmra.mxu2 %v1235_v12  ;;  %v1120_v14 = vadd.f32 %v1119_v13, %v2836_v5 }
 0x210   : > { %v1193_v20 = vadd.f32 %v1120_v14, %v896_v16 }
 0x212   : > { %v1209_v24 = vmax.f32 %v1193_v20, 0.0 }
 0x215   : > { %v1121_v18 = vpop.f32.mrf.mxu0 }
 0x216   : > { %v1122_v21 = vadd.f32 %v1121_v18, %v2836_v5  ;;  %v931_v18 = vpop.f32.mrf.mxu3 }
 0x217   : > { %v932_v44 = vadd.f32 %v931_v18, %v2903_v0 }
 0x218   : > { %v1194_v23 = vadd.f32 %v1122_v21, %v898_v19  ;;  %v925_v21 = vadd.f32 %v924_v58, %v2903_v0 }
 0x21a   : > { %v1210_v25 = vmax.f32 %v1194_v23, 0.0 }
 0x21c   : > { %v1236_v26 = vpack.c.bf16 %v1210_v25, %v1209_v24  ;;  %v927_v25 = vadd.f32 %v926_v60, %v2903_v0 }
 0x21d   : > { %v1124_v27 = vpop.f32.mrf.mxu0 }
 0x21e   : > { %1324 = vmatmul.bf16.gmra.mxu2 %v1236_v26  ;;  %v1125_v30 = vadd.f32 %v1124_v27, %v2836_v5  ;;  %v1149_v26 = vadd.f32 %v1148_v59, %v2908_v2 }
 0x220   : > { %v1195_v34 = vadd.f32 %v1125_v30, %v901_v31  ;;  %v934_v31 = vpop.f32.mrf.mxu3 }
 0x221   : > { %v935_v58 = vadd.f32 %v934_v31, %v2903_v0 }
 0x222   : > { %v1211_v38 = vmax.f32 %v1195_v34, 0.0 }
 0x225   : > { %v1126_v32 = vpop.f32.mrf.mxu0 }
 0x226   : > { %v1127_v35 = vadd.f32 %v1126_v32, %v2836_v5 }
 0x228   : > { %v1196_v36 = vadd.f32 %v1127_v35, %v903_v33 }
 0x22a   : > { %v1212_v39 = vmax.f32 %v1196_v36, 0.0 }
 0x22c   : > { %v1237_v40 = vpack.c.bf16 %v1212_v39, %v1211_v38  ;;  %v930_v39 = vadd.f32 %v929_v63, %v2903_v0 }
 0x22d   : > { %v1129_v41 = vpop.f32.mrf.mxu0 }
 0x22e   : > { %1329 = vmatmul.bf16.gmra.mxu2 %v1237_v40  ;;  %v1130_v43 = vadd.f32 %v1129_v41, %v2836_v5  ;;  %v936_v40 = vpop.f32.mrf.mxu3 }
 0x230   : > { %v1197_v49 = vadd.f32 %v1130_v43, %v906_v46 }
 0x232   : > { %v1213_v53 = vmax.f32 %v1197_v49, 0.0 }
 0x235   : > { %v1131_v47 = vpop.f32.mrf.mxu0 }
 0x236   : > { %v1132_v50 = vadd.f32 %v1131_v47, %v2836_v5  ;;  %v1150_v5 = vpop.f32.mrf.mxu1 }
 0x237   : > { %v1151_v28 = vadd.f32 %v1150_v5, %v2908_v2  ;;  %v937_v5 = vadd.f32 %v936_v40, %v2903_v0 }
 0x238   : > { %v1198_v51 = vadd.f32 %v1132_v50, %v908_v48 }
 0x23a   : > { %v1214_v54 = vmax.f32 %v1198_v51, 0.0 }
 0x23c   : > { %v1238_v56 = vpack.c.bf16 %v1214_v54, %v1213_v53  ;;  %v939_v53 = vpop.f32.mrf.mxu3 }
 0x23e   : > { %1334 = vmatmul.bf16.gmra.mxu2 %v1238_v56  ;;  %v1153_v11 = vpop.f32.mrf.mxu1 }
 0x23f   : > { %v1154_v45 = vadd.f32 %v1153_v11, %v2908_v2 }
 0x246   : > { %v1155_v20 = vpop.f32.mrf.mxu1 }
 0x247   : > { %v1156_v47 = vadd.f32 %v1155_v20, %v2908_v2 }
 0x24e   : > { %v1158_v33 = vpop.f32.mrf.mxu1 }
 0x251   : > { %v1300_v62 = vpop.f32.mrf.mxu2 }
 0x252   : > { %v1301_v1 = vadd.f32 %v2900_v6, %v1300_v62  ;;  %v1159_v62 = vadd.f32 %v1158_v33, %v2908_v2 }
 0x254   : > { %v1340_v4 = vadd.f32 %v1301_v1, %v920_v22  ;;  %v941_v22 = vpop.f32.mrf.mxu3 }
 0x255   : > { %v942_v18 = vadd.f32 %v941_v22, %v2903_v0 }
 0x256   : > { %v1356_v12 = vadd.f32 %v1340_v4, %v1144_v9  ;;  %v1160_v42 = vpop.f32.mrf.mxu1 }
 0x257   : > { %v1161_v4 = vadd.f32 %v1160_v42, %v2908_v2 }
 0x258   : > { %v1372_v15 = vmax.f32 %v1356_v12, 0.0 }
 0x259   : > { %v1302_v7 = vpop.f32.mrf.mxu2 }
 0x25a   : > { %v1303_v10 = vadd.f32 %v2900_v6, %v1302_v7 }
 0x25c   : > { %v1341_v13 = vadd.f32 %v1303_v10, %v922_v8 }
 0x25e   : > { %v1357_v14 = vadd.f32 %v1341_v13, %v1146_v61  ;;  %v1163_v56 = vpop.f32.mrf.mxu1 }
 0x260   : > { %v1373_v16 = vmax.f32 %v1357_v14, 0.0  ;;  %v944_v14 = vpop.f32.mrf.mxu3 }
 0x261   : > { %v1305_v17 = vpop.f32.mrf.mxu2  ;;  %v945_v33 = vadd.f32 %v944_v14, %v2903_v0 }
 0x262   : > { %v1404_v3 = vpack.c.bf16 %v1373_v16, %v1372_v15  ;;  %v1306_v19 = vadd.f32 %v2900_v6, %v1305_v17  ;;  %v940_v15 = vadd.f32 %v939_v53, %v2903_v0 }
 0x264   : > { %1472 = vmatmul.bf16.vlgmr.msrb.gmra.mxu3 %v1404_v3  ;;  %v1342_v23 = vadd.f32 %v1306_v19, %v925_v21  ;;  %v1164_v19 = vadd.f32 %v1163_v56, %v2908_v2 }
 0x266   : > { %v1358_v30 = vadd.f32 %v1342_v23, %v1149_v26  ;;  %v1165_v8 = vpop.f32.mrf.mxu1 }
 0x267   : > { %v1166_v21 = vadd.f32 %v1165_v8, %v2908_v2 }
 0x268   : > { %v1374_v34 = vmax.f32 %v1358_v30, 0.0  ;;  %v946_v26 = vpop.f32.mrf.mxu3 }
 0x269   : > { %v1307_v24 = vpop.f32.mrf.mxu2 }
 0x26a   : > { %v1308_v27 = vadd.f32 %v2900_v6, %v1307_v24 }
 0x26c   : > { %v1343_v29 = vadd.f32 %v1308_v27, %v927_v25 }
 0x26e   : > { %v1359_v32 = vadd.f32 %v1343_v29, %v1151_v28  ;;  %v1168_v16 = vpop.f32.mrf.mxu1 }
 0x270   : > { %v1375_v35 = vmax.f32 %v1359_v32, 0.0 }
 0x271   : > { %v1310_v36 = vpop.f32.mrf.mxu2 }
 0x272   : > { %v1405_v37 = vpack.c.bf16 %v1375_v35, %v1374_v34  ;;  %v1311_v38 = vadd.f32 %v2900_v6, %v1310_v36  ;;  %v949_v35 = vpop.f32.mrf.mxu3 }
 0x274   : > { %1477 = vmatmul.bf16.gmra.mxu3 %v1405_v37  ;;  %v1344_v41 = vadd.f32 %v1311_v38, %v930_v39  ;;  %v947_v37 = vadd.f32 %v946_v26, %v2903_v0  ;;  %v1169_v38 = vadd.f32 %v1168_v16, %v2908_v2 }
 0x276   : > { %v1360_v49 = vadd.f32 %v1344_v41, %v1154_v45  ;;  %v1170_v29 = vpop.f32.mrf.mxu1 }
 0x277   : > { %v1171_v41 = vadd.f32 %v1170_v29, %v2908_v2 }
 0x278   : > { %v1376_v51 = vmax.f32 %v1360_v49, 0.0 }
 0x279   : > { %v1312_v43 = vpop.f32.mrf.mxu2 }
 0x27a   : > { %v1313_v46 = vadd.f32 %v2900_v6, %v1312_v43  ;;  %v951_v49 = vpop.f32.mrf.mxu3 }
 0x27c   : > { %v1345_v48 = vadd.f32 %v1313_v46, %v932_v44 }
 0x27e   : > { %v1361_v50 = vadd.f32 %v1345_v48, %v1156_v47  ;;  %v1173_v40 = vpop.f32.mrf.mxu1 }
 0x27f   : > { %v1174_v56 = vadd.f32 %v1173_v40, %v2908_v2 }
 0x280   : > { %v1377_v52 = vmax.f32 %v1361_v50, 0.0 }
 0x281   : > { %v1315_v54 = vpop.f32.mrf.mxu2 }
 0x282   : > { %v1406_v55 = vpack.c.bf16 %v1377_v52, %v1376_v51  ;;  %v1316_v57 = vadd.f32 %v2900_v6, %v1315_v54  ;;  %v950_v52 = vadd.f32 %v949_v35, %v2903_v0 }
 0x284   : > { %1482 = vmatmul.bf16.gmra.mxu3 %v1406_v55  ;;  %v1346_v59 = vadd.f32 %v1316_v57, %v935_v58  ;;  %v952_v55 = vadd.f32 %v951_v49, %v2903_v0 }
 0x286   : > { %v1362_v7 = vadd.f32 %v1346_v59, %v1159_v62  ;;  %v1175_v51 = vpop.f32.mrf.mxu1 }
 0x287   : > { %v1176_v58 = vadd.f32 %v1175_v51, %v2908_v2 }
 0x288   : > { %v1378_v10 = vmax.f32 %v1362_v7, 0.0 }
 0x289   : > { %v1317_v60 = vpop.f32.mrf.mxu2 }
 0x28a   : > { %v1318_v1 = vadd.f32 %v2900_v6, %v1317_v60 }
 0x28c   : > { %v1347_v63 = vadd.f32 %v1318_v1, %v937_v5  ;;  %v954_v5 = vpop.f32.mrf.mxu3 }
 0x28e   : > { %v1363_v9 = vadd.f32 %v1347_v63, %v1161_v4  ;;  %v1178_v1 = vpop.f32.mrf.mxu1 }
 0x28f   : > { %v1179_v14 = vadd.f32 %v1178_v1, %v2908_v2 }
 0x290   : > { %v1379_v11 = vmax.f32 %v1363_v9, 0.0  ;;  %v955_v9 = vadd.f32 %v954_v5, %v2903_v0 }
 0x291   : > { %v1320_v61 = vpop.f32.mrf.mxu2 }
 0x292   : > { %v1407_v12 = vpack.c.bf16 %v1379_v11, %v1378_v10  ;;  %v1321_v13 = vadd.f32 %v2900_v6, %v1320_v61 }
 0x294   : > { %1487 = vmatmul.bf16.gmra.mxu3 %v1407_v12  ;;  %v1348_v17 = vadd.f32 %v1321_v13, %v940_v15  ;;  %v956_v10 = vpop.f32.mrf.mxu3 }
 0x295   : > { %v957_v13 = vadd.f32 %v956_v10, %v2903_v0 }
 0x296   : > { %v1364_v23 = vadd.f32 %v1348_v17, %v1164_v19  ;;  %v1180_v61 = vpop.f32.mrf.mxu1 }
 0x297   : > { %v1181_v16 = vadd.f32 %v1180_v61, %v2908_v2 }
 0x298   : > { %v1380_v27 = vmax.f32 %v1364_v23, 0.0  ;;  %v2959_v23 = vld [vmem:[%s3184_s10] ss:$0 sm:$0xff] }
 0x299   : > { %v1322_v3 = vpop.f32.mrf.mxu2 }
 0x29a   : > { %v1323_v20 = vadd.f32 %v2900_v6, %v1322_v3 }
 0x29c   : > { %v1349_v24 = vadd.f32 %v1323_v20, %v942_v18 }
 0x29e   : > { %v1365_v25 = vadd.f32 %v1349_v24, %v1166_v21 }
 0x2a0   : > { %v1381_v28 = vmax.f32 %v1365_v25, 0.0 }
 0x2a1   : > { %v1325_v30 = vpop.f32.mrf.mxu2 }
 0x2a2   : > { %v1408_v31 = vpack.c.bf16 %v1381_v28, %v1380_v27  ;;  %v1326_v32 = vadd.f32 %v2900_v6, %v1325_v30 }
 0x2a4   : > { %1492 = vmatmul.bf16.gmra.mxu3 %v1408_v31  ;;  %v1350_v34 = vadd.f32 %v1326_v32, %v945_v33 }
 0x2a6   : > { %v1366_v42 = vadd.f32 %v1350_v34, %v1169_v38 }
 0x2a8   : > { %v1382_v45 = vmax.f32 %v1366_v42, 0.0 }
 0x2a9   : > { %v1327_v36 = vpop.f32.mrf.mxu2 }
 0x2aa   : > { %v1328_v39 = vadd.f32 %v2900_v6, %v1327_v36 }
 0x2ac   : > { %v1351_v43 = vadd.f32 %v1328_v39, %v947_v37 }
 0x2ae   : > { %v1367_v44 = vadd.f32 %v1351_v43, %v1171_v41 }
 0x2b0   : > { %v1383_v46 = vmax.f32 %v1367_v44, 0.0 }
 0x2b1   : > { %v1330_v47 = vpop.f32.mrf.mxu2 }
 0x2b2   : > { %v1409_v48 = vpack.c.bf16 %v1383_v46, %v1382_v45  ;;  %v1331_v50 = vadd.f32 %v2900_v6, %v1330_v47 }
 0x2b4   : > { %1497 = vmatmul.bf16.gmra.mxu3 %v1409_v48  ;;  %v1352_v53 = vadd.f32 %v1331_v50, %v950_v52 }
 0x2b6   : > { %v1368_v59 = vadd.f32 %v1352_v53, %v1174_v56 }
 0x2b8   : > { %v1384_v22 = vmax.f32 %v1368_v59, 0.0 }
 0x2b9   : > { %v1332_v54 = vpop.f32.mrf.mxu2 }
 0x2ba   : > { %v1333_v57 = vadd.f32 %v2900_v6, %v1332_v54 }
 0x2bc   : > { %v1353_v60 = vadd.f32 %v1333_v57, %v952_v55 }
 0x2be   : > { %v1369_v62 = vadd.f32 %v1353_v60, %v1176_v58 }
 0x2c0   : > { %v1385_v4 = vmax.f32 %v1369_v62, 0.0 }
 0x2c1   : > { %v1335_v63 = vpop.f32.mrf.mxu2 }
 0x2c2   : > { %v1410_v7 = vpack.c.bf16 %v1385_v4, %v1384_v22  ;;  %v1336_v8 = vadd.f32 %v2900_v6, %v1335_v63 }
 0x2c4   : > { %1502 = vmatmul.bf16.gmra.mxu3 %v1410_v7  ;;  %v1354_v11 = vadd.f32 %v1336_v8, %v955_v9 }
 0x2c6   : > { %v1370_v17 = vadd.f32 %v1354_v11, %v1179_v14 }
 0x2c8   : > { %v1386_v19 = vmax.f32 %v1370_v17, 0.0 }
 0x2c9   : > { %v1337_v12 = vpop.f32.mrf.mxu2 }
 0x2ca   : > { %v1338_v15 = vadd.f32 %v2900_v6, %v1337_v12 }
 0x2cc   : > { %v1355_v3 = vadd.f32 %v1338_v15, %v957_v13 }
 0x2ce   : > { %v1371_v18 = vadd.f32 %v1355_v3, %v1181_v16 }
 0x2d0   : > { %v1387_v20 = vmax.f32 %v1371_v18, 0.0 }
 0x2d2   : > { %v1411_v21 = vpack.c.bf16 %v1387_v20, %v1386_v19 }
 0x2d4   : > { %1507 = vmatmul.bf16.gmra.mxu3 %v1411_v21 }
 0x2e7   : > { %v1473_v24 = vpop.f32.mrf.mxu3 }
 0x2e8   : > { %v1474_v0 = vadd.f32 %v2959_v23, %v1473_v24 }
 0x2ea   : > { %v1514_v6 = vsel %vm1513_vm1, %v1474_v0, -inf }
 0x2eb   : > { %1515 = vmax.xlane.f32.xlu0 %v1514_v6 }
 0x2ef   : > { %v1475_v2 = vpop.f32.mrf.mxu3 }
 0x2f0   : > { %v2964_v25 = vadd.f32 %v2959_v23, %v1475_v2 }
 0x2f2   : > { %v1517_v26 = vsel %vm1513_vm1, %v2964_v25, -inf }
 0x2f3   : > { %1518 = vmax.xlane.f32.xlu0 %v1517_v26 }
 0x2f7   : > { %v1478_v27 = vpop.f32.mrf.mxu3 }
 0x2f8   : > { %v2969_v28 = vadd.f32 %v2959_v23, %v1478_v27 }
 0x2fa   : > { %v1520_v29 = vsel %vm1513_vm1, %v2969_v28, -inf }
 0x2fb   : > { %1521 = vmax.xlane.f32.xlu1 %v1520_v29 }
 0x2ff   : > { %v1480_v30 = vpop.f32.mrf.mxu3 }
 0x300   : > { %v2974_v31 = vadd.f32 %v2959_v23, %v1480_v30 }
 0x302   : > { %v1523_v32 = vsel %vm1513_vm1, %v2974_v31, -inf }
 0x303   : > { %1524 = vmax.xlane.f32.xlu1 %v1523_v32 }
 0x307   : > { %v1483_v33 = vpop.f32.mrf.mxu3 }
 0x308   : > { %v2979_v34 = vadd.f32 %v2959_v23, %v1483_v33 }
 0x30a   : > { %v1526_v35 = vsel %vm1513_vm1, %v2979_v34, -inf }
 0x30b   : > { %1527 = vmax.xlane.f32.xlu2 %v1526_v35 }
 0x30f   : > { %v1485_v36 = vpop.f32.mrf.mxu3 }
 0x310   : > { %v2984_v37 = vadd.f32 %v2959_v23, %v1485_v36 }
 0x312   : > { %v1529_v38 = vsel %vm1513_vm1, %v2984_v37, -inf }
 0x313   : > { %1530 = vmax.xlane.f32.xlu2 %v1529_v38 }
 0x317   : > { %v1488_v39 = vpop.f32.mrf.mxu3 }
 0x318   : > { %v2989_v40 = vadd.f32 %v2959_v23, %v1488_v39 }
 0x31a   : > { %v1532_v41 = vsel %vm1513_vm1, %v2989_v40, -inf }
 0x31b   : > { %1533 = vmax.xlane.f32.xlu0 %v1532_v41 }
 0x31f   : > { %v1490_v42 = vpop.f32.mrf.mxu3 }
 0x320   : > { %v2994_v43 = vadd.f32 %v2959_v23, %v1490_v42 }
 0x322   : > { %v1535_v44 = vsel %vm1513_vm1, %v2994_v43, -inf }
 0x323   : > { %1536 = vmax.xlane.f32.xlu1 %v1535_v44 }
 0x327   : > { %v1493_v45 = vpop.f32.mrf.mxu3 }
 0x328   : > { %v2999_v46 = vadd.f32 %v2959_v23, %v1493_v45 }
 0x32a   : > { %v1538_v47 = vsel %vm1513_vm1, %v2999_v46, -inf }
 0x32b   : > { %1539 = vmax.xlane.f32.xlu2 %v1538_v47 }
 0x32f   : > { %v1495_v48 = vpop.f32.mrf.mxu3 }
 0x330   : > { %v3004_v49 = vadd.f32 %v2959_v23, %v1495_v48 }
 0x332   : > { %v1541_v50 = vsel %vm1513_vm1, %v3004_v49, -inf }
 0x333   : > { %1542 = vmax.xlane.f32.xlu0 %v1541_v50 }
 0x337   : > { %v1498_v51 = vpop.f32.mrf.mxu3 }
 0x338   : > { %v3009_v52 = vadd.f32 %v2959_v23, %v1498_v51 }
 0x33a   : > { %v1544_v53 = vsel %vm1513_vm1, %v3009_v52, -inf }
 0x33b   : > { %1545 = vmax.xlane.f32.xlu1 %v1544_v53 }
 0x33f   : > { %v1500_v54 = vpop.f32.mrf.mxu3 }
 0x340   : > { %v3014_v55 = vadd.f32 %v2959_v23, %v1500_v54 }
 0x342   : > { %v1547_v56 = vsel %vm1513_vm1, %v3014_v55, -inf }
 0x343   : > { %1548 = vmax.xlane.f32.xlu2 %v1547_v56 }
 0x347   : > { %v1503_v57 = vpop.f32.mrf.mxu3 }
 0x348   : > { %v3019_v58 = vadd.f32 %v2959_v23, %v1503_v57 }
 0x34a   : > { %v1550_v59 = vsel %vm1513_vm1, %v3019_v58, -inf }
 0x34b   : > { %1551 = vmax.xlane.f32.xlu0 %v1550_v59 }
 0x34f   : > { %v1505_v60 = vpop.f32.mrf.mxu3 }
 0x350   : > { %v3024_v5 = vadd.f32 %v2959_v23, %v1505_v60 }
 0x352   : > { %v1553_v62 = vsel %vm1513_vm1, %v3024_v5, -inf }
 0x353   : > { %1554 = vmax.xlane.f32.xlu1 %v1553_v62 }
 0x357   : > { %v1508_v1 = vpop.f32.mrf.mxu3 }
 0x358   : > { %v3029_v22 = vadd.f32 %v2959_v23, %v1508_v1 }
 0x35a   : > { %v1556_v4 = vsel %vm1513_vm1, %v3029_v22, -inf }
 0x35b   : > { %1557 = vmax.xlane.f32.xlu2 %v1556_v4 }
 0x35e   : > { %v1516_v63 = vpop.xlane.xlu0 %1515 }
 0x35f   : > { %v3033_v7 = vsub.f32 %v1474_v0, %v1516_v63  ;;  %v1510_v8 = vpop.f32.mrf.mxu3 }
 0x360   : > { %v3036_v9 = vadd.f32 %v2959_v23, %v1510_v8 }
 0x361   : > { %v1578_v10 = vmul.f32 1.442695, %v3033_v7 }
 0x362   : > { %v1559_v11 = vsel %vm1513_vm1, %v3036_v9, -inf }
 0x363   : > { %2253 = vpow2.f32 %v1578_v10  ;;  %1560 = vmax.xlane.f32.xlu0 %v1559_v11 }
 0x366   : > { %v1519_v61 = vpop.xlane.xlu0 %1518 }
 0x367   : > { %v3042_v12 = vsub.f32 %v2964_v25, %v1519_v61 }
 0x369   : > { %v2254_v13 = vpop.eup %2253  ;;  %v1580_v14 = vmul.f32 1.442695, %v3042_v12 }
 0x36a   : > { %v1610_v15 = vsel %vm1513_vm1, %v2254_v13, 0.0 }
 0x36b   : > { %2255 = vpow2.f32 %v1580_v14  ;;  %1611 = vadd.xlane.f32.xlu1 %v1610_v15 }
 0x36e   : > { %v1522_v16 = vpop.xlane.xlu1 %1521 }
 0x36f   : > { %v3047_v17 = vsub.f32 %v2969_v28, %v1522_v16 }
 0x371   : > { %v2256_v3 = vpop.eup %2255  ;;  %v1582_v18 = vmul.f32 1.442695, %v3047_v17 }
 0x372   : > { %v1613_v19 = vsel %vm1513_vm1, %v2256_v3, 0.0 }
 0x373   : > { %2257 = vpow2.f32 %v1582_v18  ;;  %1614 = vadd.xlane.f32.xlu2 %v1613_v19 }
 0x376   : > { %v1525_v20 = vpop.xlane.xlu1 %1524 }
 0x377   : > { %v3052_v21 = vsub.f32 %v2974_v31, %v1525_v20 }
 0x379   : > { %v2258_v23 = vpop.eup %2257  ;;  %v1584_v24 = vmul.f32 1.442695, %v3052_v21 }
 0x37a   : > { %v1616_v0 = vsel %vm1513_vm1, %v2258_v23, 0.0 }
 0x37b   : > { %2259 = vpow2.f32 %v1584_v24  ;;  %1617 = vadd.xlane.f32.xlu0 %v1616_v0 }
 0x37e   : > { %v1528_v6 = vpop.xlane.xlu2 %1527 }
 0x37f   : > { %v3057_v2 = vsub.f32 %v2979_v34, %v1528_v6 }
 0x381   : > { %v2260_v25 = vpop.eup %2259  ;;  %v1586_v26 = vmul.f32 1.442695, %v3057_v2 }
 0x382   : > { %v1619_v27 = vsel %vm1513_vm1, %v2260_v25, 0.0 }
 0x383   : > { %2261 = vpow2.f32 %v1586_v26  ;;  %1620 = vadd.xlane.f32.xlu1 %v1619_v27 }
 0x386   : > { %v1531_v28 = vpop.xlane.xlu2 %1530 }
 0x387   : > { %v3062_v29 = vsub.f32 %v2984_v37, %v1531_v28 }
 0x389   : > { %v2262_v30 = vpop.eup %2261  ;;  %v1588_v31 = vmul.f32 1.442695, %v3062_v29 }
 0x38a   : > { %v1622_v32 = vsel %vm1513_vm1, %v2262_v30, 0.0 }
 0x38b   : > { %2263 = vpow2.f32 %v1588_v31  ;;  %1623 = vadd.xlane.f32.xlu2 %v1622_v32 }
 0x38e   : > { %v1534_v33 = vpop.xlane.xlu0 %1533 }
 0x38f   : > { %v3067_v34 = vsub.f32 %v2989_v40, %v1534_v33 }
 0x391   : > { %v2264_v35 = vpop.eup %2263  ;;  %v1590_v36 = vmul.f32 1.442695, %v3067_v34 }
 0x392   : > { %v1625_v38 = vsel %vm1513_vm1, %v2264_v35, 0.0 }
 0x393   : > { %2265 = vpow2.f32 %v1590_v36  ;;  %1626 = vadd.xlane.f32.xlu0 %v1625_v38 }
 0x396   : > { %v1537_v37 = vpop.xlane.xlu1 %1536 }
 0x397   : > { %v3072_v39 = vsub.f32 %v2994_v43, %v1537_v37 }
 0x399   : > { %v2266_v41 = vpop.eup %2265  ;;  %v1592_v42 = vmul.f32 1.442695, %v3072_v39 }
 0x39a   : > { %v1628_v44 = vsel %vm1513_vm1, %v2266_v41, 0.0 }
 0x39b   : > { %2267 = vpow2.f32 %v1592_v42  ;;  %1629 = vadd.xlane.f32.xlu1 %v1628_v44 }
 0x39e   : > { %v1540_v40 = vpop.xlane.xlu2 %1539 }
 0x39f   : > { %v3077_v45 = vsub.f32 %v2999_v46, %v1540_v40 }
 0x3a1   : > { %v2268_v47 = vpop.eup %2267  ;;  %v1594_v48 = vmul.f32 1.442695, %v3077_v45 }
 0x3a2   : > { %v1631_v50 = vsel %vm1513_vm1, %v2268_v47, 0.0 }
 0x3a3   : > { %2269 = vpow2.f32 %v1594_v48  ;;  %1632 = vadd.xlane.f32.xlu2 %v1631_v50 }
 0x3a6   : > { %v1543_v43 = vpop.xlane.xlu0 %1542 }
 0x3a7   : > { %v3082_v51 = vsub.f32 %v3004_v49, %v1543_v43 }
 0x3a9   : > { %v2270_v53 = vpop.eup %2269  ;;  %v1596_v54 = vmul.f32 1.442695, %v3082_v51 }
 0x3aa   : > { %v1634_v56 = vsel %vm1513_vm1, %v2270_v53, 0.0 }
 0x3ab   : > { %2271 = vpow2.f32 %v1596_v54  ;;  %1635 = vadd.xlane.f32.xlu0 %v1634_v56 }
 0x3ae   : > { %v1546_v46 = vpop.xlane.xlu1 %1545 }
 0x3af   : > { %v3087_v57 = vsub.f32 %v3009_v52, %v1546_v46 }
 0x3b1   : > { %v2272_v59 = vpop.eup %2271  ;;  %v1598_v60 = vmul.f32 1.442695, %v3087_v57 }
 0x3b2   : > { %v1637_v62 = vsel %vm1513_vm1, %v2272_v59, 0.0 }
 0x3b3   : > { %2273 = vpow2.f32 %v1598_v60  ;;  %1638 = vadd.xlane.f32.xlu1 %v1637_v62 }
 0x3b6   : > { %v1549_v49 = vpop.xlane.xlu2 %1548 }
 0x3b7   : > { %v3092_v1 = vsub.f32 %v3014_v55, %v1549_v49 }
 0x3b9   : > { %v2274_v4 = vpop.eup %2273  ;;  %v1600_v63 = vmul.f32 1.442695, %v3092_v1 }
 0x3ba   : > { %v1640_v8 = vsel %vm1513_vm1, %v2274_v4, 0.0 }
 0x3bb   : > { %2275 = vpow2.f32 %v1600_v63  ;;  %1641 = vadd.xlane.f32.xlu2 %v1640_v8 }
 0x3be   : > { %v1552_v52 = vpop.xlane.xlu0 %1551 }
 0x3bf   : > { %v3097_v10 = vsub.f32 %v3019_v58, %v1552_v52 }
 0x3c1   : > { %v2276_v11 = vpop.eup %2275  ;;  %v1602_v61 = vmul.f32 1.442695, %v3097_v10 }
 0x3c2   : > { %v1643_v13 = vsel %vm1513_vm1, %v2276_v11, 0.0 }
 0x3c3   : > { %2277 = vpow2.f32 %v1602_v61  ;;  %1644 = vadd.xlane.f32.xlu0 %v1643_v13 }
 0x3c6   : > { %v1555_v55 = vpop.xlane.xlu1 %1554 }
 0x3c7   : > { %v3102_v14 = vsub.f32 %v3024_v5, %v1555_v55 }
 0x3c9   : > { %v2278_v15 = vpop.eup %2277  ;;  %v1604_v16 = vmul.f32 1.442695, %v3102_v14 }
 0x3ca   : > { %v1646_v3 = vsel %vm1513_vm1, %v2278_v15, 0.0 }
 0x3cb   : > { %2279 = vpow2.f32 %v1604_v16  ;;  %1647 = vadd.xlane.f32.xlu1 %v1646_v3 }
 0x3ce   : > { %v1558_v58 = vpop.xlane.xlu2 %1557 }
 0x3cf   : > { %v3107_v18 = vsub.f32 %v3029_v22, %v1558_v58 }
 0x3d1   : > { %v2280_v19 = vpop.eup %2279  ;;  %v1606_v20 = vmul.f32 1.442695, %v3107_v18 }
 0x3d2   : > { %v1649_v23 = vsel %vm1513_vm1, %v2280_v19, 0.0 }
 0x3d3   : > { %2281 = vpow2.f32 %v1606_v20  ;;  %1650 = vadd.xlane.f32.xlu2 %v1649_v23 }
 0x3d6   : > { %v1561_v5 = vpop.xlane.xlu0 %1560 }
 0x3d7   : > { %v3112_v24 = vsub.f32 %v3036_v9, %v1561_v5 }
 0x3d9   : > { %v2282_v0 = vpop.eup %2281  ;;  %v1608_v6 = vmul.f32 1.442695, %v3112_v24 }
 0x3da   : > { %v1652_v25 = vsel %vm1513_vm1, %v2282_v0, 0.0 }
 0x3db   : > { %2283 = vpow2.f32 %v1608_v6  ;;  %1653 = vadd.xlane.f32.xlu0 %v1652_v25 }
 0x3de   : > { %v1612_v22 = vpop.xlane.xlu1 %1611 }
 0x3df   : > { %2285 = vlog2.f32 %v1612_v22 }
 0x3e1   : > { %v2284_v26 = vpop.eup %2283 }
 0x3e2   : > { %v1655_v27 = vsel %vm1513_vm1, %v2284_v26, 0.0 }
 0x3e3   : > { %1656 = vadd.xlane.f32.xlu1 %v1655_v27 }
 0x3e5   : > { %v2286_v28 = vpop.eup %2285 }
 0x3e6   : > { %v1659_v30 = vmul.f32 0.6931472, %v2286_v28  ;;  %v1615_v31 = vpop.xlane.xlu2 %1614 }
 0x3e7   : > { %2287 = vlog2.f32 %v1615_v31 }
 0x3e8   : > { %v1690_v9 = vsub.f32 %v3033_v7, %v1659_v30 }
 0x3ea   : > { %1706 = vst.msk [vmem:[%s3121_s22] sm:$0xff] %vm1513_vm1, %v1690_v9 }
 0x3ed   : > { %v2288_v32 = vpop.eup %2287 }
 0x3ee   : > { %v1661_v33 = vmul.f32 0.6931472, %v2288_v32  ;;  %v1618_v35 = vpop.xlane.xlu0 %1617 }
 0x3ef   : > { %2289 = vlog2.f32 %v1618_v35 }
 0x3f0   : > { %v1691_v36 = vsub.f32 %v3042_v12, %v1661_v33 }
 0x3f2   : > { %1707 = vst.msk [vmem:[%s3121_s22 + $0x8] sm:$0xff] %vm1513_vm1, %v1691_v36 }
 0x3f5   : > { %v2290_v38 = vpop.eup %2289 }
 0x3f6   : > { %v1663_v37 = vmul.f32 0.6931472, %v2290_v38  ;;  %v1621_v41 = vpop.xlane.xlu1 %1620 }
 0x3f7   : > { %2291 = vlog2.f32 %v1621_v41 }
 0x3f8   : > { %v1692_v42 = vsub.f32 %v3047_v17, %v1663_v37 }
 0x3fa   : > { %1708 = vst.msk [vmem:[%s3121_s22 + $0x10] sm:$0xff] %vm1513_vm1, %v1692_v42 }
 0x3fd   : > { %v2292_v7 = vpop.eup %2291 }
 0x3fe   : > { %v1665_v44 = vmul.f32 0.6931472, %v2292_v7  ;;  %v1624_v40 = vpop.xlane.xlu2 %1623 }
 0x3ff   : > { %2293 = vlog2.f32 %v1624_v40 }
 0x400   : > { %v1693_v47 = vsub.f32 %v3052_v21, %v1665_v44 }
 0x402   : > { %1709 = vst.msk [vmem:[%s3121_s22 + $0x18] sm:$0xff] %vm1513_vm1, %v1693_v47 }
 0x405   : > { %v2294_v12 = vpop.eup %2293 }
 0x406   : > { %v1667_v48 = vmul.f32 0.6931472, %v2294_v12  ;;  %v1627_v50 = vpop.xlane.xlu0 %1626 }
 0x407   : > { %2295 = vlog2.f32 %v1627_v50 }
 0x408   : > { %v1694_v43 = vsub.f32 %v3057_v2, %v1667_v48 }
 0x40a   : > { %1710 = vst.msk [vmem:[%s3121_s22 + $0x20] sm:$0xff] %vm1513_vm1, %v1694_v43 }
 0x40d   : > { %v2296_v17 = vpop.eup %2295 }
 0x40e   : > { %v1669_v53 = vmul.f32 0.6931472, %v2296_v17  ;;  %v1630_v54 = vpop.xlane.xlu1 %1629 }
 0x40f   : > { %2297 = vlog2.f32 %v1630_v54 }
 0x410   : > { %v1695_v56 = vsub.f32 %v3062_v29, %v1669_v53 }
 0x412   : > { %1711 = vst.msk [vmem:[%s3121_s22 + $0x28] sm:$0xff] %vm1513_vm1, %v1695_v56 }
 0x415   : > { %v2298_v21 = vpop.eup %2297 }
 0x416   : > { %v1671_v46 = vmul.f32 0.6931472, %v2298_v21  ;;  %v1633_v59 = vpop.xlane.xlu2 %1632 }
 0x417   : > { %2299 = vlog2.f32 %v1633_v59 }
 0x418   : > { %v1696_v60 = vsub.f32 %v3067_v34, %v1671_v46 }
 0x41a   : > { %1712 = vst.msk [vmem:[%s3121_s22 + $0x30] sm:$0xff] %vm1513_vm1, %v1696_v60 }
 0x41d   : > { %v2300_v2 = vpop.eup %2299 }
 0x41e   : > { %v1673_v62 = vmul.f32 0.6931472, %v2300_v2  ;;  %v1636_v49 = vpop.xlane.xlu0 %1635 }
 0x41f   : > { %2301 = vlog2.f32 %v1636_v49 }
 0x420   : > { %v1697_v4 = vsub.f32 %v3072_v39, %v1673_v62 }
 0x422   : > { %1713 = vst.msk [vmem:[%s3121_s22 + $0x38] sm:$0xff] %vm1513_vm1, %v1697_v4 }
 0x425   : > { %v2302_v29 = vpop.eup %2301 }
 0x426   : > { %v1675_v63 = vmul.f32 0.6931472, %v2302_v29  ;;  %v1639_v8 = vpop.xlane.xlu1 %1638 }
 0x427   : > { %2303 = vlog2.f32 %v1639_v8 }
 0x428   : > { %v1698_v52 = vsub.f32 %v3077_v45, %v1675_v63 }
 0x42a   : > { %1714 = vst.msk [vmem:[%s3121_s22 + $0x40] sm:$0xff] %vm1513_vm1, %v1698_v52 }
 0x42d   : > { %v2304_v34 = vpop.eup %2303 }
 0x42e   : > { %v1677_v11 = vmul.f32 0.6931472, %v2304_v34  ;;  %v1642_v61 = vpop.xlane.xlu2 %1641 }
 0x42f   : > { %2305 = vlog2.f32 %v1642_v61 }
 0x430   : > { %v1699_v13 = vsub.f32 %v3082_v51, %v1677_v11 }
 0x432   : > { %1715 = vst.msk [vmem:[%s3121_s22 + $0x48] sm:$0xff] %vm1513_vm1, %v1699_v13 }
 0x435   : > { %v2306_v39 = vpop.eup %2305 }
 0x436   : > { %v1679_v55 = vmul.f32 0.6931472, %v2306_v39  ;;  %v1645_v15 = vpop.xlane.xlu0 %1644 }
 0x437   : > { %2307 = vlog2.f32 %v1645_v15 }
 0x438   : > { %v1700_v16 = vsub.f32 %v3087_v57, %v1679_v55 }
 0x43a   : > { %1716 = vst.msk [vmem:[%s3121_s22 + $0x50] sm:$0xff] %vm1513_vm1, %v1700_v16 }
 0x43d   : > { %v2308_v45 = vpop.eup %2307 }
 0x43e   : > { %v1681_v3 = vmul.f32 0.6931472, %v2308_v45  ;;  %v1648_v58 = vpop.xlane.xlu1 %1647 }
 0x43f   : > { %2309 = vlog2.f32 %v1648_v58 }
 0x440   : > { %v1701_v19 = vsub.f32 %v3092_v1, %v1681_v3 }
 0x442   : > { %1717 = vst.msk [vmem:[%s3121_s22 + $0x58] sm:$0xff] %vm1513_vm1, %v1701_v19 }
 0x445   : > { %v2310_v51 = vpop.eup %2309 }
 0x446   : > { %v1683_v20 = vmul.f32 0.6931472, %v2310_v51  ;;  %v1651_v23 = vpop.xlane.xlu2 %1650 }
 0x447   : > { %2311 = vlog2.f32 %v1651_v23 }
 0x448   : > { %v1702_v5 = vsub.f32 %v3097_v10, %v1683_v20 }
 0x44a   : > { %1718 = vst.msk [vmem:[%s3121_s22 + $0x60] sm:$0xff] %vm1513_vm1, %v1702_v5 }
 0x44d   : > { %v2312_v57 = vpop.eup %2311 }
 0x44e   : > { %v1685_v0 = vmul.f32 0.6931472, %v2312_v57  ;;  %v1654_v6 = vpop.xlane.xlu0 %1653 }
 0x44f   : > { %2313 = vlog2.f32 %v1654_v6 }
 0x450   : > { %v1703_v25 = vsub.f32 %v3102_v14, %v1685_v0 }
 0x452   : > { %1719 = vst.msk [vmem:[%s3121_s22 + $0x68] sm:$0xff] %vm1513_vm1, %v1703_v25 }
 0x455   : > { %v2314_v1 = vpop.eup %2313 }
 0x456   : > { %v1687_v22 = vmul.f32 0.6931472, %v2314_v1  ;;  %v1657_v26 = vpop.xlane.xlu1 %1656 }
 0x457   : > { %2315 = vlog2.f32 %v1657_v26 }
 0x458   : > { %v1704_v27 = vsub.f32 %v3107_v18, %v1687_v22 }
 0x45a   : > { %1720 = vst.msk [vmem:[%s3121_s22 + $0x70] sm:$0xff] %vm1513_vm1, %v1704_v27 }
 0x45d   : > { %v2316_v10 = vpop.eup %2315 }
 0x45e   : > { %v1689_v28 = vmul.f32 0.6931472, %v2316_v10 }
 0x460   : > { %v1705_v30 = vsub.f32 %v3112_v24, %v1689_v28 }
 0x462   : > { %1721 = vst.msk [vmem:[%s3121_s22 + $0x78] sm:$0xff] %vm1513_vm1, %v1705_v30 }
 0x463 PF: > { %s24_s17 = sadd.s32 1, %s2485_s17  }
 0x464   : > { %p21_p7 = scmp.ge.s32.totalorder %s24_s17, 4  }
 0x466   :  { %23 = sbr.rel (!%p21_p7) target bundleno = 5 (0x5), region = 115 }
 0x46b   :  { %1744 = vsyncpa [#allocation3], 1 }
 0x46c   :  { %1746 = vsyncpa [#allocation3 + $0x1], 1 }
 0x46d   :  { %1747 = vsyncpa [#allocation5], 1 }
 0x46e   :  { %1748 = vsyncpa [#allocation8], 1 }

</bundles_post_ra>
